<compile_context>
chip_gen: v7x
topology: tpu7x:2x2x1
jax: 0.10.0
libtpu: 0.0.40
codegen_flags: <defaults>
</compile_context>

<pallas_src>
import functools

import jax
import jax.numpy as jnp
from jax.experimental import pallas as pl
from jax.experimental.pallas import tpu as pltpu

COMPUTE_DTYPE = jnp.bfloat16


# ----------------------------- Pallas kernel ------------------------------ #
def yoga_gcn_kernel(a_ref, xw1_ref, w_ref, b_ref, p_ref, wfc_ref, bfc_ref,
                    out_ref, h_ref, *, num_layers):
    # Layer 0: h = relu(A_hat @ (X @ W1) + b0).  The wrapper-precomputed X@W1
    # is used directly as the RHS; no staging copy.
    h = jnp.dot(a_ref[...], xw1_ref[...], preferred_element_type=jnp.float32)
    h_ref[...] = jnp.maximum(h + b_ref[0], 0.0).astype(COMPUTE_DTYPE)

    # Layers 1..L-1: hw = h @ W_l ; h = relu(A_hat @ hw + b_l).
    for l in range(1, num_layers):
        hw = jnp.dot(h_ref[...], w_ref[l - 1],
                     preferred_element_type=jnp.float32).astype(COMPUTE_DTYPE)
        h = jnp.dot(a_ref[...], hw, preferred_element_type=jnp.float32)
        h_ref[...] = jnp.maximum(h + b_ref[l], 0.0).astype(COMPUTE_DTYPE)

    # global_mean_pool as one [G, N] x [N, H] matmul, then the classifier into
    # a lane-dense padded [G, C_PAD] slab.
    pooled = jnp.dot(p_ref[...], h_ref[...],
                     preferred_element_type=jnp.float32).astype(COMPUTE_DTYPE)
    out_ref[...] = (jnp.dot(pooled, wfc_ref[...],
                            preferred_element_type=jnp.float32) + bfc_ref[...])


def yoga_gcn_forward(a_hat, xw1, w_layers, biases, pool, w_fc_pad, b_fc_pad,
                     *, num_classes=4):
    """a_hat [N,N] bf16, xw1=[N,H]=X@W1 bf16, w_layers [L-1,H,H] bf16,
    biases [L,1,H] f32, pool [G,N] bf16, w_fc_pad [H,C_PAD] bf16,
    b_fc_pad [1,C_PAD] f32.  Returns [G, num_classes] f32."""
    n, hidden = xw1.shape
    g = pool.shape[0]
    c_pad = w_fc_pad.shape[1]
    num_layers = biases.shape[0]
    assert w_layers.shape[0] == num_layers - 1

    # Everything is VMEM-resident (inputs are double-buffered by the pipeline);
    # keep a conservative budget so this also fits v7x's 64 MiB/TC.
    resident = 2 * (a_hat.nbytes + xw1.nbytes + w_layers.nbytes + biases.nbytes
                    + pool.nbytes + w_fc_pad.nbytes + b_fc_pad.nbytes)
    resident += n * hidden * 2 + 2 * g * c_pad * 4   # h scratch + out buffers
    assert resident < 40 * 1024 * 1024, (
        "A_hat no longer fits VMEM-resident; this model size needs the "
        "streamed / block-diagonal large-N path")

    out = pl.pallas_call(
        functools.partial(yoga_gcn_kernel, num_layers=num_layers),
        out_shape=jax.ShapeDtypeStruct((g, c_pad), jnp.float32),
        grid_spec=pltpu.PrefetchScalarGridSpec(
            num_scalar_prefetch=0,
            grid=(1,),
            in_specs=[
                pl.BlockSpec((n, n), lambda i: (0, 0)),                  # A_hat
                pl.BlockSpec((n, hidden), lambda i: (0, 0)),             # X @ W1
                pl.BlockSpec((num_layers - 1, hidden, hidden),
                             lambda i: (0, 0, 0)),                       # W_2..L
                pl.BlockSpec((num_layers, 1, hidden), lambda i: (0, 0, 0)),
                pl.BlockSpec((g, n), lambda i: (0, 0)),                  # pool
                pl.BlockSpec((hidden, c_pad), lambda i: (0, 0)),         # fc W
                pl.BlockSpec((1, c_pad), lambda i: (0, 0)),              # fc b
            ],
            out_specs=pl.BlockSpec((g, c_pad), lambda i: (0, 0)),
            scratch_shapes=[pltpu.VMEM((n, hidden), COMPUTE_DTYPE)]),    # h
        compiler_params=pltpu.CompilerParams(
            dimension_semantics=("arbitrary",)),
    )(a_hat, xw1, w_layers, biases, pool, w_fc_pad, b_fc_pad)
    return out[:, :num_classes]


# ------------------------------ JAX glue ---------------------------------- #
def gcn_normalized_adjacency(edge_index, num_nodes):
    """Dense D^{-1/2} (A + I) D^{-1/2}, matching PyG GCNConv's gcn_norm."""
    row, col = edge_index[0], edge_index[1]          # source, target
    loop = jnp.arange(num_nodes, dtype=edge_index.dtype)
    row = jnp.concatenate([row, loop])
    col = jnp.concatenate([col, loop])
    w = jnp.ones(row.shape[0], jnp.float32)
    deg = jnp.zeros((num_nodes,), jnp.float32).at[col].add(w)
    dinv = jnp.where(deg > 0, 1.0 / jnp.sqrt(deg), 0.0)
    norm = dinv[row] * dinv[col]
    # out[target] += norm * x[source]  ->  A_hat[target, source] += norm
    return jnp.zeros((num_nodes, num_nodes), jnp.float32).at[col, row].add(norm)


def mean_pool_matrix(batch, num_graphs):
    onehot = (batch[None, :] == jnp.arange(num_graphs)[:, None]).astype(jnp.float32)
    counts = jnp.maximum(onehot.sum(axis=1, keepdims=True), 1.0)
    return onehot / counts                           # [G, N]


def reference_forward(a_hat, xw1, w_layers, biases, pool, w_fc, b_fc):
    """Pure-JAX reference mirroring the kernel's bf16-operand / f32-accum math."""
    f32 = jnp.float32
    h = jnp.maximum(jnp.dot(a_hat, xw1, preferred_element_type=f32) + biases[0],
                    0.0).astype(COMPUTE_DTYPE)
    for l in range(1, biases.shape[0]):
        hw = jnp.dot(h, w_layers[l - 1],
                     preferred_element_type=f32).astype(COMPUTE_DTYPE)
        h = jnp.maximum(jnp.dot(a_hat, hw, preferred_element_type=f32) + biases[l],
                        0.0).astype(COMPUTE_DTYPE)
    pooled = jnp.dot(pool, h, preferred_element_type=f32).astype(COMPUTE_DTYPE)
    return jnp.dot(pooled, w_fc, preferred_element_type=f32) + b_fc


# -------------------------------- Main ------------------------------------ #
if __name__ == "__main__":
    # YogaGCN(in_channels=3, hidden_dim=128, num_classes=4) — module defaults.
    IN_CH, HIDDEN, NUM_CLASSES = 3, 128, 4
    NODES_PER_GRAPH, NUM_GRAPHS = 32, 8
    N = NODES_PER_GRAPH * NUM_GRAPHS                 # 256 nodes
    NUM_LAYERS = 4
    C_PAD = 128                                      # lane-dense padded classes

    key = jax.random.PRNGKey(0)
    kx, k1, k2, k3, k4, kfc, kb, kbf = jax.random.split(key, 8)

    # node features [N, 3] (keypoint coordinates)
    x = jax.random.normal(kx, (N, IN_CH), jnp.float32)

    # edge_index: a bidirectional ring inside each graph
    edges = []
    for gi in range(NUM_GRAPHS):
        off = gi * NODES_PER_GRAPH
        for i in range(NODES_PER_GRAPH):
            j = (i + 1) % NODES_PER_GRAPH
            edges.append((off + i, off + j))
            edges.append((off + j, off + i))
    edge_index = jnp.array(edges, dtype=jnp.int32).T                     # [2, E]
    batch = jnp.repeat(jnp.arange(NUM_GRAPHS, dtype=jnp.int32), NODES_PER_GRAPH)

    def glorot(k, shape):
        fan_in, fan_out = shape[-2], shape[-1]
        s = jnp.sqrt(6.0 / (fan_in + fan_out))
        return jax.random.uniform(k, shape, jnp.float32, -s, s)

    w1 = glorot(k1, (IN_CH, HIDDEN))
    w234 = jnp.stack([glorot(k, (HIDDEN, HIDDEN)) for k in (k2, k3, k4)])
    biases = 0.1 * jax.random.normal(kb, (NUM_LAYERS, 1, HIDDEN), jnp.float32)
    w_fc = glorot(kfc, (HIDDEN, NUM_CLASSES))
    b_fc = 0.1 * jax.random.normal(kbf, (1, NUM_CLASSES), jnp.float32)

    # graph-structure glue: dense normalized adjacency + mean-pool matrix
    a_hat = gcn_normalized_adjacency(edge_index, N)                      # [N, N]
    pool = mean_pool_matrix(batch, NUM_GRAPHS)                           # [G, N]

    # bf16 operands (f32 accumulation inside the kernel). Layer-0's feature
    # transform X @ W1 is folded here and consumed directly by the kernel.
    a_bf = a_hat.astype(jnp.bfloat16)
    xw1 = jnp.dot(x, w1, preferred_element_type=jnp.float32).astype(jnp.bfloat16)
    w_layers = w234.astype(jnp.bfloat16)                                 # [L-1,H,H]
    pool_bf = pool.astype(jnp.bfloat16)
    w_fc_pad = jnp.pad(w_fc, ((0, 0), (0, C_PAD - NUM_CLASSES))).astype(jnp.bfloat16)
    b_fc_pad = jnp.pad(b_fc, ((0, 0), (0, C_PAD - NUM_CLASSES)))

    out = yoga_gcn_forward(a_bf, xw1, w_layers, biases, pool_bf, w_fc_pad,
                           b_fc_pad, num_classes=NUM_CLASSES)
    out = jax.block_until_ready(out)

    ref = reference_forward(a_bf, xw1, w_layers, biases, pool_bf, w_fc_pad,
                            b_fc_pad)[:, :NUM_CLASSES]
    assert out.shape == (NUM_GRAPHS, NUM_CLASSES)
    assert jnp.allclose(out, ref, atol=2e-2, rtol=2e-2), \
        float(jnp.max(jnp.abs(out - ref)))

    print("KERNEL_OK")
</pallas_src>

<mosaic_0001>
module attributes {stable_mosaic.version = 11 : i64} {
  func.func @yoga_gcn_kernel(%arg0: i32, %arg1: memref<256x256xbf16, #tpu.memory_space<vmem>>, %arg2: memref<256x128xbf16, #tpu.memory_space<vmem>>, %arg3: memref<3x128x128xbf16, #tpu.memory_space<vmem>>, %arg4: memref<4x1x128xf32, #tpu.memory_space<vmem>>, %arg5: memref<8x256xbf16, #tpu.memory_space<vmem>>, %arg6: memref<128x128xbf16, #tpu.memory_space<vmem>>, %arg7: memref<1x128xf32, #tpu.memory_space<vmem>>, %arg8: memref<8x128xf32, #tpu.memory_space<vmem>>, %arg9: memref<256x128xbf16, #tpu.memory_space<vmem>>) attributes {dimension_semantics = [#tpu.dimension_semantics<arbitrary>], iteration_bounds = array<i64: 1>, scalar_prefetch = 0 : i64, scratch_operands = 1 : i64, tpu.core_type = #tpu.core_type<tc>, window_params = [{pipeline_mode = #tpu.pipeline_mode<synchronous>, transform_indices = @transform_0, window_bounds = array<i64: 256, 256>}, {pipeline_mode = #tpu.pipeline_mode<synchronous>, transform_indices = @transform_1, window_bounds = array<i64: 256, 128>}, {pipeline_mode = #tpu.pipeline_mode<synchronous>, transform_indices = @transform_2, window_bounds = array<i64: 3, 128, 128>}, {pipeline_mode = #tpu.pipeline_mode<synchronous>, transform_indices = @transform_3, window_bounds = array<i64: 4, 1, 128>}, {pipeline_mode = #tpu.pipeline_mode<synchronous>, transform_indices = @transform_4, window_bounds = array<i64: 8, 256>}, {pipeline_mode = #tpu.pipeline_mode<synchronous>, transform_indices = @transform_5, window_bounds = array<i64: 128, 128>}, {pipeline_mode = #tpu.pipeline_mode<synchronous>, transform_indices = @transform_6, window_bounds = array<i64: 1, 128>}, {pipeline_mode = #tpu.pipeline_mode<synchronous>, transform_indices = @transform_7, window_bounds = array<i64: 8, 128>}]} {
    %c0 = arith.constant 0 : index
    %c0_0 = arith.constant 0 : index
    %0 = vector.load %arg1[%c0, %c0_0] : memref<256x256xbf16, #tpu.memory_space<vmem>>, vector<256x256xbf16>
    %c0_1 = arith.constant 0 : index
    %c0_2 = arith.constant 0 : index
    %1 = vector.load %arg2[%c0_1, %c0_2] : memref<256x128xbf16, #tpu.memory_space<vmem>>, vector<256x128xbf16>
    %cst = arith.constant dense<0.000000e+00> : vector<256x128xf32>
    %2 = tpu.matmul %0, %1, %cst {dimension_numbers = #tpu.dot_dimension_numbers<[1], [0], [0], [1], [0, 0, 1, 1], [], []>} : vector<256x256xbf16>, vector<256x128xbf16>, vector<256x128xf32> -> vector<256x128xf32>
    %c0_3 = arith.constant 0 : index
    %c0_4 = arith.constant 0 : index
    %c0_5 = arith.constant 0 : index
    %3 = vector.load %arg4[%c0_3, %c0_4, %c0_5] : memref<4x1x128xf32, #tpu.memory_space<vmem>>, vector<1x1x128xf32>
    %4 = vector.shape_cast %3 : vector<1x1x128xf32> to vector<1x128xf32>
    %5 = vector.broadcast %4 : vector<1x128xf32> to vector<256x128xf32>
    %6 = arith.addf %2, %5 : vector<256x128xf32>
    %cst_6 = arith.constant 0.000000e+00 : f32
    %7 = vector.broadcast %cst_6 : f32 to vector<256x128xf32>
    %8 = arith.maximumf %6, %7 : vector<256x128xf32>
    %9 = arith.truncf %8 : vector<256x128xf32> to vector<256x128xbf16>
    %c0_7 = arith.constant 0 : index
    %c0_8 = arith.constant 0 : index
    %10 = vector.load %arg9[%c0_7, %c0_8] : memref<256x128xbf16, #tpu.memory_space<vmem>>, vector<256x128xbf16>
    tpu.vector_store %arg9[%c0_7, %c0_8], %9 {strides = array<i32>} : memref<256x128xbf16, #tpu.memory_space<vmem>>, vector<256x128xbf16>,
    %c0_9 = arith.constant 0 : index
    %c0_10 = arith.constant 0 : index
    %11 = vector.load %arg9[%c0_9, %c0_10] : memref<256x128xbf16, #tpu.memory_space<vmem>>, vector<256x128xbf16>
    %c0_11 = arith.constant 0 : index
    %c0_12 = arith.constant 0 : index
    %c0_13 = arith.constant 0 : index
    %12 = vector.load %arg3[%c0_11, %c0_12, %c0_13] : memref<3x128x128xbf16, #tpu.memory_space<vmem>>, vector<1x128x128xbf16>
    %13 = vector.shape_cast %12 : vector<1x128x128xbf16> to vector<128x128xbf16>
    %cst_14 = arith.constant dense<0.000000e+00> : vector<256x128xf32>
    %14 = tpu.matmul %11, %13, %cst_14 {dimension_numbers = #tpu.dot_dimension_numbers<[1], [0], [0], [1], [0, 0, 1, 1], [], []>} : vector<256x128xbf16>, vector<128x128xbf16>, vector<256x128xf32> -> vector<256x128xf32>
    %15 = arith.truncf %14 : vector<256x128xf32> to vector<256x128xbf16>
    %c0_15 = arith.constant 0 : index
    %c0_16 = arith.constant 0 : index
    %16 = vector.load %arg1[%c0_15, %c0_16] : memref<256x256xbf16, #tpu.memory_space<vmem>>, vector<256x256xbf16>
    %cst_17 = arith.constant dense<0.000000e+00> : vector<256x128xf32>
    %17 = tpu.matmul %16, %15, %cst_17 {dimension_numbers = #tpu.dot_dimension_numbers<[1], [0], [0], [1], [0, 0, 1, 1], [], []>} : vector<256x256xbf16>, vector<256x128xbf16>, vector<256x128xf32> -> vector<256x128xf32>
    %c1 = arith.constant 1 : index
    %c0_18 = arith.constant 0 : index
    %c0_19 = arith.constant 0 : index
    %18 = vector.load %arg4[%c1, %c0_18, %c0_19] : memref<4x1x128xf32, #tpu.memory_space<vmem>>, vector<1x1x128xf32>
    %19 = vector.shape_cast %18 : vector<1x1x128xf32> to vector<1x128xf32>
    %20 = vector.broadcast %19 : vector<1x128xf32> to vector<256x128xf32>
    %21 = arith.addf %17, %20 : vector<256x128xf32>
    %cst_20 = arith.constant 0.000000e+00 : f32
    %22 = vector.broadcast %cst_20 : f32 to vector<256x128xf32>
    %23 = arith.maximumf %21, %22 : vector<256x128xf32>
    %24 = arith.truncf %23 : vector<256x128xf32> to vector<256x128xbf16>
    %c0_21 = arith.constant 0 : index
    %c0_22 = arith.constant 0 : index
    %25 = vector.load %arg9[%c0_21, %c0_22] : memref<256x128xbf16, #tpu.memory_space<vmem>>, vector<256x128xbf16>
    tpu.vector_store %arg9[%c0_21, %c0_22], %24 {strides = array<i32>} : memref<256x128xbf16, #tpu.memory_space<vmem>>, vector<256x128xbf16>,
    %c0_23 = arith.constant 0 : index
    %c0_24 = arith.constant 0 : index
    %26 = vector.load %arg9[%c0_23, %c0_24] : memref<256x128xbf16, #tpu.memory_space<vmem>>, vector<256x128xbf16>
    %c1_25 = arith.constant 1 : index
    %c0_26 = arith.constant 0 : index
    %c0_27 = arith.constant 0 : index
    %27 = vector.load %arg3[%c1_25, %c0_26, %c0_27] : memref<3x128x128xbf16, #tpu.memory_space<vmem>>, vector<1x128x128xbf16>
    %28 = vector.shape_cast %27 : vector<1x128x128xbf16> to vector<128x128xbf16>
    %cst_28 = arith.constant dense<0.000000e+00> : vector<256x128xf32>
    %29 = tpu.matmul %26, %28, %cst_28 {dimension_numbers = #tpu.dot_dimension_numbers<[1], [0], [0], [1], [0, 0, 1, 1], [], []>} : vector<256x128xbf16>, vector<128x128xbf16>, vector<256x128xf32> -> vector<256x128xf32>
    %30 = arith.truncf %29 : vector<256x128xf32> to vector<256x128xbf16>
    %c0_29 = arith.constant 0 : index
    %c0_30 = arith.constant 0 : index
    %31 = vector.load %arg1[%c0_29, %c0_30] : memref<256x256xbf16, #tpu.memory_space<vmem>>, vector<256x256xbf16>
    %cst_31 = arith.constant dense<0.000000e+00> : vector<256x128xf32>
    %32 = tpu.matmul %31, %30, %cst_31 {dimension_numbers = #tpu.dot_dimension_numbers<[1], [0], [0], [1], [0, 0, 1, 1], [], []>} : vector<256x256xbf16>, vector<256x128xbf16>, vector<256x128xf32> -> vector<256x128xf32>
    %c2 = arith.constant 2 : index
    %c0_32 = arith.constant 0 : index
    %c0_33 = arith.constant 0 : index
    %33 = vector.load %arg4[%c2, %c0_32, %c0_33] : memref<4x1x128xf32, #tpu.memory_space<vmem>>, vector<1x1x128xf32>
    %34 = vector.shape_cast %33 : vector<1x1x128xf32> to vector<1x128xf32>
    %35 = vector.broadcast %34 : vector<1x128xf32> to vector<256x128xf32>
    %36 = arith.addf %32, %35 : vector<256x128xf32>
    %cst_34 = arith.constant 0.000000e+00 : f32
    %37 = vector.broadcast %cst_34 : f32 to vector<256x128xf32>
    %38 = arith.maximumf %36, %37 : vector<256x128xf32>
    %39 = arith.truncf %38 : vector<256x128xf32> to vector<256x128xbf16>
    %c0_35 = arith.constant 0 : index
    %c0_36 = arith.constant 0 : index
    %40 = vector.load %arg9[%c0_35, %c0_36] : memref<256x128xbf16, #tpu.memory_space<vmem>>, vector<256x128xbf16>
    tpu.vector_store %arg9[%c0_35, %c0_36], %39 {strides = array<i32>} : memref<256x128xbf16, #tpu.memory_space<vmem>>, vector<256x128xbf16>,
    %c0_37 = arith.constant 0 : index
    %c0_38 = arith.constant 0 : index
    %41 = vector.load %arg9[%c0_37, %c0_38] : memref<256x128xbf16, #tpu.memory_space<vmem>>, vector<256x128xbf16>
    %c2_39 = arith.constant 2 : index
    %c0_40 = arith.constant 0 : index
    %c0_41 = arith.constant 0 : index
    %42 = vector.load %arg3[%c2_39, %c0_40, %c0_41] : memref<3x128x128xbf16, #tpu.memory_space<vmem>>, vector<1x128x128xbf16>
    %43 = vector.shape_cast %42 : vector<1x128x128xbf16> to vector<128x128xbf16>
    %cst_42 = arith.constant dense<0.000000e+00> : vector<256x128xf32>
    %44 = tpu.matmul %41, %43, %cst_42 {dimension_numbers = #tpu.dot_dimension_numbers<[1], [0], [0], [1], [0, 0, 1, 1], [], []>} : vector<256x128xbf16>, vector<128x128xbf16>, vector<256x128xf32> -> vector<256x128xf32>
    %45 = arith.truncf %44 : vector<256x128xf32> to vector<256x128xbf16>
    %c0_43 = arith.constant 0 : index
    %c0_44 = arith.constant 0 : index
    %46 = vector.load %arg1[%c0_43, %c0_44] : memref<256x256xbf16, #tpu.memory_space<vmem>>, vector<256x256xbf16>
    %cst_45 = arith.constant dense<0.000000e+00> : vector<256x128xf32>
    %47 = tpu.matmul %46, %45, %cst_45 {dimension_numbers = #tpu.dot_dimension_numbers<[1], [0], [0], [1], [0, 0, 1, 1], [], []>} : vector<256x256xbf16>, vector<256x128xbf16>, vector<256x128xf32> -> vector<256x128xf32>
    %c3 = arith.constant 3 : index
    %c0_46 = arith.constant 0 : index
    %c0_47 = arith.constant 0 : index
    %48 = vector.load %arg4[%c3, %c0_46, %c0_47] : memref<4x1x128xf32, #tpu.memory_space<vmem>>, vector<1x1x128xf32>
    %49 = vector.shape_cast %48 : vector<1x1x128xf32> to vector<1x128xf32>
    %50 = vector.broadcast %49 : vector<1x128xf32> to vector<256x128xf32>
    %51 = arith.addf %47, %50 : vector<256x128xf32>
    %cst_48 = arith.constant 0.000000e+00 : f32
    %52 = vector.broadcast %cst_48 : f32 to vector<256x128xf32>
    %53 = arith.maximumf %51, %52 : vector<256x128xf32>
    %54 = arith.truncf %53 : vector<256x128xf32> to vector<256x128xbf16>
    %c0_49 = arith.constant 0 : index
    %c0_50 = arith.constant 0 : index
    %55 = vector.load %arg9[%c0_49, %c0_50] : memref<256x128xbf16, #tpu.memory_space<vmem>>, vector<256x128xbf16>
    tpu.vector_store %arg9[%c0_49, %c0_50], %54 {strides = array<i32>} : memref<256x128xbf16, #tpu.memory_space<vmem>>, vector<256x128xbf16>,
    %c0_51 = arith.constant 0 : index
    %c0_52 = arith.constant 0 : index
    %56 = vector.load %arg5[%c0_51, %c0_52] : memref<8x256xbf16, #tpu.memory_space<vmem>>, vector<8x256xbf16>
    %c0_53 = arith.constant 0 : index
    %c0_54 = arith.constant 0 : index
    %57 = vector.load %arg9[%c0_53, %c0_54] : memref<256x128xbf16, #tpu.memory_space<vmem>>, vector<256x128xbf16>
    %cst_55 = arith.constant dense<0.000000e+00> : vector<8x128xf32>
    %58 = tpu.matmul %56, %57, %cst_55 {dimension_numbers = #tpu.dot_dimension_numbers<[1], [0], [0], [1], [0, 0, 1, 1], [], []>} : vector<8x256xbf16>, vector<256x128xbf16>, vector<8x128xf32> -> vector<8x128xf32>
    %59 = arith.truncf %58 : vector<8x128xf32> to vector<8x128xbf16>
    %c0_56 = arith.constant 0 : index
    %c0_57 = arith.constant 0 : index
    %60 = vector.load %arg6[%c0_56, %c0_57] : memref<128x128xbf16, #tpu.memory_space<vmem>>, vector<128x128xbf16>
    %cst_58 = arith.constant dense<0.000000e+00> : vector<8x128xf32>
    %61 = tpu.matmul %59, %60, %cst_58 {dimension_numbers = #tpu.dot_dimension_numbers<[1], [0], [0], [1], [0, 0, 1, 1], [], []>} : vector<8x128xbf16>, vector<128x128xbf16>, vector<8x128xf32> -> vector<8x128xf32>
    %c0_59 = arith.constant 0 : index
    %c0_60 = arith.constant 0 : index
    %62 = vector.load %arg7[%c0_59, %c0_60] : memref<1x128xf32, #tpu.memory_space<vmem>>, vector<1x128xf32>
    %63 = vector.broadcast %62 : vector<1x128xf32> to vector<8x128xf32>
    %64 = arith.addf %61, %63 : vector<8x128xf32>
    %c0_61 = arith.constant 0 : index
    %c0_62 = arith.constant 0 : index
    %65 = vector.load %arg8[%c0_61, %c0_62] : memref<8x128xf32, #tpu.memory_space<vmem>>, vector<8x128xf32>
    tpu.vector_store %arg8[%c0_61, %c0_62], %64 {strides = array<i32>} : memref<8x128xf32, #tpu.memory_space<vmem>>, vector<8x128xf32>,
    return
  }
  func.func @transform_0(%arg0: i32) -> (i32, i32) {
    %c0_i32 = arith.constant 0 : i32
    %c0_i32_0 = arith.constant 0 : i32
    %c0_i32_1 = arith.constant 0 : i32
    return %c0_i32, %c0_i32_0 : i32, i32
  }
  func.func @transform_1(%arg0: i32) -> (i32, i32) {
    %c0_i32 = arith.constant 0 : i32
    %c0_i32_0 = arith.constant 0 : i32
    %c0_i32_1 = arith.constant 0 : i32
    return %c0_i32, %c0_i32_0 : i32, i32
  }
  func.func @transform_2(%arg0: i32) -> (i32, i32, i32) {
    %c0_i32 = arith.constant 0 : i32
    %c0_i32_0 = arith.constant 0 : i32
    %c0_i32_1 = arith.constant 0 : i32
    %c0_i32_2 = arith.constant 0 : i32
    return %c0_i32, %c0_i32_0, %c0_i32_1 : i32, i32, i32
  }
  func.func @transform_3(%arg0: i32) -> (i32, i32, i32) {
    %c0_i32 = arith.constant 0 : i32
    %c0_i32_0 = arith.constant 0 : i32
    %c0_i32_1 = arith.constant 0 : i32
    %c0_i32_2 = arith.constant 0 : i32
    return %c0_i32, %c0_i32_0, %c0_i32_1 : i32, i32, i32
  }
  func.func @transform_4(%arg0: i32) -> (i32, i32) {
    %c0_i32 = arith.constant 0 : i32
    %c0_i32_0 = arith.constant 0 : i32
    %c0_i32_1 = arith.constant 0 : i32
    return %c0_i32, %c0_i32_0 : i32, i32
  }
  func.func @transform_5(%arg0: i32) -> (i32, i32) {
    %c0_i32 = arith.constant 0 : i32
    %c0_i32_0 = arith.constant 0 : i32
    %c0_i32_1 = arith.constant 0 : i32
    return %c0_i32, %c0_i32_0 : i32, i32
  }
  func.func @transform_6(%arg0: i32) -> (i32, i32) {
    %c0_i32 = arith.constant 0 : i32
    %c0_i32_0 = arith.constant 0 : i32
    %c0_i32_1 = arith.constant 0 : i32
    return %c0_i32, %c0_i32_0 : i32, i32
  }
  func.func @transform_7(%arg0: i32) -> (i32, i32) {
    %c0_i32 = arith.constant 0 : i32
    %c0_i32_0 = arith.constant 0 : i32
    %c0_i32_1 = arith.constant 0 : i32
    return %c0_i32, %c0_i32_0 : i32, i32
  }
}

</mosaic_0001>

<bundles_post_ra>
// kernel: tpu_custom_call.1
= control target key start
LH: loop header
LB: loop body
LE: loop exit
PB: predicated region body
PF: predicated region fallthrough
CT: control target
= control target key end

     0   :  { %12 = vsyncpa [#allocation4], 0  ;;  %s4620_s0 = inlined_call_operand.hbm [shape: bf16[256,256], index: 0, kind: input, shape index: {}]   ;;  %s4621_s1 = inlined_call_operand.hbm [shape: bf16[256,128], index: 1, kind: input, shape index: {}]   ;;  %s4622_s2 = inlined_call_operand.hbm [shape: bf16[3,128,128], index: 2, kind: input, shape index: {}]   ;;  %s4623_s3 = inlined_call_operand.vmem [shape: f32[4,1,128], index: 3, kind: input, shape index: {}]   ;;  %s4624_s4 = inlined_call_operand.vmem [shape: bf16[8,256], index: 4, kind: input, shape index: {}]   ;;  %s4625_s5 = inlined_call_operand.hbm [shape: bf16[128,128], index: 5, kind: input, shape index: {}]   ;;  %s4626_s6 = inlined_call_operand.vmem [shape: f32[1,128], index: 6, kind: input, shape index: {}]   ;;  %s4627_s7 = inlined_call_operand.hbm [shape: f32[8,128], index: 7, kind: output, shape index: {}]  }
   0x1   :  { %13 = vsyncpa [#allocation7], 0 }
   0x2   :  { %14 = vsyncpa [#allocation10], 0 }
   0x3   :  { %15 = vsyncpa [#allocation5], 0  ;;  %s4053_s24 = smov [#allocation6]   ;;  %s3935_s28 = scalar_lea.hbm %s4621_s1, 2048 }
   0x4   :  { %s33_s25 = sshll.u32 %s4053_s24, 4  ;;  %p3936_p0 = scmp.ne.s32.totalorder %s4621_s1, %s3935_s28  ;;  %s34_s25 = int_to_ptr.vmem [resolvable:$true] %s33_s25 }
   0x5   :  { %p3939_p1 = scmp.lt.u32.totalorder %s3935_s28, %s4621_s1 }
   0x7   :  { %p3941_p2 = pnand %p3939_p1, %p3936_p0 }
   0x9   :  { %3944 = shalt.err (!%p3941_p2)
}
   0xa   :  { %s3945_s10 = scalar_lea.vmem %s34_s25, 2048  ;;  %p3950_p4 = scmp.lt.s32.totalorder %s34_s25, %s34_s25 }
   0xb   :  { %p3946_p3 = scmp.ne.s32.totalorder %s34_s25, %s3945_s10  ;;  %p3951_p5 = scmp.lt.s32.totalorder %s3945_s10, %s3945_s10 }
   0xd   :  { %p3952_p6 = por %p3951_p5, %p3950_p4 }
   0xf   :  { %p3953_p7 = pnand %p3952_p6, %p3946_p3 }
  0x11   :  { %3956 = shalt.err (!%p3953_p7)
}
  0x12   :  { %s4054_s11 = smov 64   ;;  %s4055_s12 = smov 4  }
  0x13   :  { %39 = dma.hbm_to_vmem [thread:$0]  %s4621_s1, 2048, %s34_s25, [#allocation7], %s4054_s11, %s4054_s11, %s4055_s12  }
  0x14   :  { %s4056_s15 = smov [#allocation3]   ;;  %s3957_s19 = scalar_lea.hbm %s4620_s0, 4096 }
  0x15   :  { %s21_s16 = sshll.u32 %s4056_s15, 4  ;;  %p3958_p8 = scmp.ne.s32.totalorder %s4620_s0, %s3957_s19  ;;  %s22_s16 = int_to_ptr.vmem [resolvable:$true] %s21_s16 }
  0x16   :  { %p3961_p9 = scmp.lt.u32.totalorder %s3957_s19, %s4620_s0 }
  0x18   :  { %p3963_p10 = pnand %p3961_p9, %p3958_p8 }
  0x1a   :  { %3966 = shalt.err (!%p3963_p10)
}
  0x1b   :  { %s3967_s24 = scalar_lea.vmem %s22_s16, 4096  ;;  %p3972_p12 = scmp.lt.s32.totalorder %s22_s16, %s22_s16 }
  0x1c   :  { %p3968_p11 = scmp.ne.s32.totalorder %s22_s16, %s3967_s24  ;;  %p3973_p13 = scmp.lt.s32.totalorder %s3967_s24, %s3967_s24 }
  0x1e   :  { %p3974_p0 = por %p3973_p13, %p3972_p12 }
  0x20   :  { %p3975_p1 = pnand %p3974_p0, %p3968_p11 }
  0x22   :  { %3978 = shalt.err (!%p3975_p1)
}
  0x23   :  { %s4057_s1 = smov 128   ;;  %s4058_s25 = smov 8  }
  0x24   :  { %27 = dma.hbm_to_vmem [thread:$0]  %s4620_s0, 4096, %s22_s16, [#allocation4], %s4057_s1, %s4057_s1, %s4058_s25  }
  0x25   :  { %s4059_s28 = smov [#allocation8]   ;;  %s4060_s30 = smov [#allocation9]  }
  0x26   :  { %s45_s29 = sshll.u32 %s4059_s28, 4  ;;  %s61_s8 = sshll.u32 %s4060_s30, 4  ;;  %s46_s29 = int_to_ptr.vmem [resolvable:$true] %s45_s29  ;;  %s4131_s8 = int_to_ptr.vmem [resolvable:$true] %s61_s8 }
  0x27   :  { %s3979_s13 = scalar_lea.hbm %s4622_s2, 3072 }
  0x28   :  { %p3980_p2 = scmp.ne.s32.totalorder %s4622_s2, %s3979_s13  ;;  %p3983_p3 = scmp.lt.u32.totalorder %s3979_s13, %s4622_s2 }
  0x2a   :  { %p3985_p4 = pnand %p3983_p3, %p3980_p2 }
  0x2c   :  { %3988 = shalt.err (!%p3985_p4)
}
  0x2d   :  { %s3989_s0 = scalar_lea.vmem %s46_s29, 3072  ;;  %p3994_p6 = scmp.lt.s32.totalorder %s46_s29, %s46_s29 }
  0x2e   :  { %p3990_p5 = scmp.ne.s32.totalorder %s46_s29, %s3989_s0  ;;  %p3995_p7 = scmp.lt.s32.totalorder %s3989_s0, %s3989_s0 }
  0x30   :  { %p3996_p8 = por %p3995_p7, %p3994_p6 }
  0x32   :  { %p3997_p9 = pnand %p3996_p8, %p3990_p5 }
  0x34   :  { %4000 = shalt.err (!%p3997_p9)
}
  0x35   :  { %51 = dma.hbm_to_vmem [thread:$0]  %s4622_s2, 3072, %s46_s29, [#allocation7], %s4054_s11, %s4054_s11, %s4055_s12  }
  0x36   :  { %s4001_s22 = scalar_lea.hbm %s4625_s5, 1024 }
  0x37   :  { %p4002_p10 = scmp.ne.s32.totalorder %s4625_s5, %s4001_s22  ;;  %p4005_p11 = scmp.lt.u32.totalorder %s4001_s22, %s4625_s5 }
  0x39   :  { %p4007_p12 = pnand %p4005_p11, %p4002_p10 }
  0x3b   :  { %4010 = shalt.err (!%p4007_p12)
}
  0x3c   :  { %s4011_s26 = scalar_lea.vmem %s4131_s8, 1024  ;;  %p4016_p0 = scmp.lt.s32.totalorder %s4131_s8, %s4131_s8 }
  0x3d   :  { %p4012_p13 = scmp.ne.s32.totalorder %s4131_s8, %s4011_s26  ;;  %p4017_p1 = scmp.lt.s32.totalorder %s4011_s26, %s4011_s26 }
  0x3f   :  { %p4018_p2 = por %p4017_p1, %p4016_p0 }
  0x41   :  { %p4019_p3 = pnand %p4018_p2, %p4012_p13 }
  0x43   :  { %4022 = shalt.err (!%p4019_p3)
}
  0x44   :  { %67 = dma.hbm_to_vmem [thread:$0]  %s4625_s5, 1024, %s4131_s8, [#allocation10], %s4054_s11, %s4054_s11, %s4055_s12  }
  0x45   :  { %4045 = dma.done.wait [#allocation4], 4096  }
  0x46   :  { %4046 = vsyncadd [#allocation4], 4294963200 }
  0x47   :  { %4047 = dma.done.wait [#allocation7], 5120  }
  0x48   :  { %4048 = vsyncadd [#allocation7], 4294962176 }
  0x49   :  { %4049 = dma.done.wait [#allocation10], 1024  }
  0x4a   :  { %4050 = vsyncadd [#allocation10], 4294966272  ;;  %v3789_v0 = vld [vmem:[#allocation6 + $0x40] sm:$0xff]   ;;  %v3791_v2 = vld [vmem:[#allocation6 + $0x48] sm:$0xff]   ;;  %vm4062_vm0 = vmmov 0   ;;  %s4063_s14 = smov [#allocation11]  }
  0x4b   :  { %v3790_v1 = vld [vmem:[#allocation6] sm:$0xff]   ;;  %3063 = vmatprep.subr.bf16.mxu0 %v3789_v0  ;;  %v3792_v3 = vld [vmem:[#allocation6 + $0x8] sm:$0xff]   ;;  %v3793_v4 = vld [vmem:[#allocation6 + $0x50] sm:$0xff]   ;;  %s2866_s15 = sshll.u32 %s4063_s14, 4  ;;  %s2867_s15 = int_to_ptr.vmem [resolvable:$true] %s2866_s15 }
  0x4c   :  { %3064 = vmatpush3.bf16.msra.mxu0 %v3790_v1  ;;  %v3794_v5 = vld [vmem:[#allocation6 + $0x10] sm:$0xff]   ;;  %v3795_v6 = vld [vmem:[#allocation6 + $0x58] sm:$0xff]   ;;  %v3797_v8 = vld [vmem:[#allocation6 + $0x60] sm:$0xff]   ;;  %s4023_s17 = scalar_lea.vmem %s2867_s15, 128  ;;  %p4028_p5 = scmp.lt.s32.totalorder %s2867_s15, %s2867_s15 }
  0x4d   :  { %3065 = vmatprep.subr.bf16.mxu0 %v3791_v2  ;;  %v3796_v7 = vld [vmem:[#allocation6 + $0x18] sm:$0xff]   ;;  %v3798_v9 = vld [vmem:[#allocation6 + $0x20] sm:$0xff]   ;;  %v3799_v10 = vld [vmem:[#allocation6 + $0x68] sm:$0xff]   ;;  %p4024_p4 = scmp.ne.s32.totalorder %s2867_s15, %s4023_s17  ;;  %p4029_p6 = scmp.lt.s32.totalorder %s4023_s17, %s4023_s17 }
  0x4e   :  { %v4168_v11 = vld [vmem:[#allocation3 + $0x4] ss:$8 sps:$4 sm:$0xff]   ;;  %v3801_v13 = vld [vmem:[#allocation6 + $0x70] sm:$0xff]   ;;  %v3803_v15 = vld [vmem:[#allocation6 + $0x78] sm:$0xff]  }
  0x4f   :  { %v3800_v12 = vld [vmem:[#allocation6 + $0x28] sm:$0xff]   ;;  %442 = vmatprep.mubr.bf16.mxu0 %v4168_v11  ;;  %v3802_v14 = vld [vmem:[#allocation6 + $0x30] sm:$0xff]   ;;  %v3804_v16 = vld [vmem:[#allocation6 + $0x38] sm:$0xff]   ;;  %p4030_p7 = por %p4029_p6, %p4028_p5 }
  0x50   :  { %3066 = vmatpush3.bf16.msra.mxu0 %v3792_v3  ;;  %v4171_v17 = vld [vmem:[#allocation3] ss:$8 sps:$4 sm:$0xff]   ;;  %v4173_v18 = vld [vmem:[#allocation3 + $0x14] ss:$8 sps:$4 sm:$0xff]   ;;  %v4177_v19 = vld [vmem:[#allocation3 + $0x10] ss:$8 sps:$4 sm:$0xff]  }
  0x51   :  { %3067 = vmatprep.subr.bf16.mxu0 %v3793_v4  ;;  %v4179_v20 = vld [vmem:[#allocation3 + $0x24] ss:$8 sps:$4 sm:$0xff]   ;;  %v3855_v23 = vld [vmem:[#allocation8 + $0x10] sm:$0xff]   ;;  %v4183_v24 = vld [vmem:[#allocation3 + $0x20] ss:$8 sps:$4 sm:$0xff]   ;;  %p4031_p8 = pnand %p4030_p7, %p4024_p4 }
  0x52   :  { %v3853_v21 = vld [vmem:[#allocation8] sm:$0xff]   ;;  %v3854_v22 = vld [vmem:[#allocation8 + $0x8] sm:$0xff]   ;;  %v4185_v25 = vld [vmem:[#allocation3 + $0x34] ss:$8 sps:$4 sm:$0xff]  }
  0x53   :  { %3614 = vmatprep.subr.bf16.mxu1 %v3853_v21  ;;  %v4189_v26 = vld [vmem:[#allocation3 + $0x30] ss:$8 sps:$4 sm:$0xff]   ;;  %v4191_v27 = vld [vmem:[#allocation3 + $0x44] ss:$8 sps:$4 sm:$0xff]   ;;  %v4195_v28 = vld [vmem:[#allocation3 + $0x40] ss:$8 sps:$4 sm:$0xff]  }
  0x54   :  { %3068 = vmatpush3.bf16.msra.mxu0 %v3794_v5  ;;  %3615 = vmatpush3.bf16.msra.mxu1 %v3853_v21  ;;  %v4197_v29 = vld [vmem:[#allocation3 + $0x54] ss:$8 sps:$4 sm:$0xff]   ;;  %v4201_v30 = vld [vmem:[#allocation3 + $0x50] ss:$8 sps:$4 sm:$0xff]   ;;  %v4203_v31 = vld [vmem:[#allocation3 + $0x64] ss:$8 sps:$4 sm:$0xff]  }
  0x55   :  { %3069 = vmatprep.subr.bf16.mxu0 %v3795_v6  ;;  %3616 = vmatprep.subr.bf16.mxu1 %v3854_v22  ;;  %v4207_v32 = vld [vmem:[#allocation3 + $0x60] ss:$8 sps:$4 sm:$0xff]   ;;  %v4209_v33 = vld [vmem:[#allocation3 + $0x74] ss:$8 sps:$4 sm:$0xff]   ;;  %v4213_v34 = vld [vmem:[#allocation3 + $0x70] ss:$8 sps:$4 sm:$0xff]  }
  0x56   :  { %v4215_v35 = vld [vmem:[#allocation3 + $0x84] ss:$8 sps:$4 sm:$0xff]   ;;  %v4219_v36 = vld [vmem:[#allocation3 + $0x80] ss:$8 sps:$4 sm:$0xff]   ;;  %v4221_v37 = vld [vmem:[#allocation3 + $0x94] ss:$8 sps:$4 sm:$0xff]  }
  0x57   :  { %v4225_v38 = vld [vmem:[#allocation3 + $0x90] ss:$8 sps:$4 sm:$0xff]   ;;  %v4227_v39 = vld [vmem:[#allocation3 + $0xa4] ss:$8 sps:$4 sm:$0xff]   ;;  %v4231_v40 = vld [vmem:[#allocation3 + $0xa0] ss:$8 sps:$4 sm:$0xff]  }
  0x58   :  { %3070 = vmatpush3.bf16.msra.mxu0 %v3796_v7  ;;  %3617 = vmatpush3.bf16.msra.mxu1 %v3854_v22  ;;  %v4233_v41 = vld [vmem:[#allocation3 + $0xb4] ss:$8 sps:$4 sm:$0xff]   ;;  %v4237_v43 = vld [vmem:[#allocation3 + $0xb0] ss:$8 sps:$4 sm:$0xff]   ;;  %v4239_v44 = vld [vmem:[#allocation3 + $0xc4] ss:$8 sps:$4 sm:$0xff]  }
  0x59   :  { %3071 = vmatprep.subr.bf16.mxu0 %v3797_v8  ;;  %3618 = vmatprep.subr.bf16.mxu1 %v3855_v23  ;;  %v3856_v42 = vld [vmem:[#allocation8 + $0x18] sm:$0xff]   ;;  %v3857_v45 = vld [vmem:[#allocation8 + $0x20] sm:$0xff]   ;;  %v3858_v46 = vld [vmem:[#allocation8 + $0x28] sm:$0xff]  }
  0x5a   :  { %v4243_v47 = vld [vmem:[#allocation3 + $0xc0] ss:$8 sps:$4 sm:$0xff]   ;;  %v4245_v48 = vld [vmem:[#allocation3 + $0xd4] ss:$8 sps:$4 sm:$0xff]   ;;  %v4249_v51 = vld [vmem:[#allocation3 + $0xd0] ss:$8 sps:$4 sm:$0xff]  }
  0x5b   :  { %v3859_v49 = vld [vmem:[#allocation8 + $0x30] sm:$0xff]   ;;  %v3860_v50 = vld [vmem:[#allocation8 + $0x38] sm:$0xff]   ;;  %v4251_v52 = vld [vmem:[#allocation3 + $0xe4] ss:$8 sps:$4 sm:$0xff]  }
  0x5c   :  { %3072 = vmatpush3.bf16.msra.mxu0 %v3798_v9  ;;  %3619 = vmatpush3.bf16.msra.mxu1 %v3855_v23  ;;  %v4255_v53 = vld [vmem:[#allocation3 + $0xe0] ss:$8 sps:$4 sm:$0xff]   ;;  %v4257_v54 = vld [vmem:[#allocation3 + $0xf4] ss:$8 sps:$4 sm:$0xff]   ;;  %v4261_v55 = vld [vmem:[#allocation3 + $0xf0] ss:$8 sps:$4 sm:$0xff]  }
  0x5d   :  { %3073 = vmatprep.subr.bf16.mxu0 %v3799_v10  ;;  %3620 = vmatprep.subr.bf16.mxu1 %v3856_v42  ;;  %v4267_v58 = vld [vmem:[%s4623_s3] ss:$0 sm:$0xff] }
  0x60   :  { %3074 = vmatpush3.bf16.msra.mxu0 %v3800_v12  ;;  %3621 = vmatpush3.bf16.msra.mxu1 %v3856_v42 }
  0x61   :  { %3075 = vmatprep.subr.bf16.mxu0 %v3801_v13  ;;  %3622 = vmatprep.subr.bf16.mxu1 %v3857_v45 }
  0x64   :  { %3076 = vmatpush3.bf16.msra.mxu0 %v3802_v14  ;;  %3623 = vmatpush3.bf16.msra.mxu1 %v3857_v45 }
  0x65   :  { %3077 = vmatprep.subr.bf16.mxu0 %v3803_v15  ;;  %3624 = vmatprep.subr.bf16.mxu1 %v3858_v46 }
  0x68   :  { %3078 = vmatpush3.bf16.msra.mxu0 %v3804_v16  ;;  %3625 = vmatpush3.bf16.msra.mxu1 %v3858_v46 }
  0x69   :  { %3626 = vmatprep.subr.bf16.mxu1 %v3859_v49 }
  0x6b   :  { %443 = vmatmul.mubr.bf16.vlgmr.msra.gmra.mrb[0].mxu0 %v4171_v17 }
  0x6c   :  { %450 = vmatprep.mubr.bf16.mxu0 %v4173_v18  ;;  %3627 = vmatpush3.bf16.msra.mxu1 %v3859_v49 }
  0x6d   :  { %3628 = vmatprep.subr.bf16.mxu1 %v3860_v50 }
  0x70   :  { %3629 = vmatpush3.bf16.msra.mxu1 %v3860_v50 }
  0x73   :  { %451 = vmatmul.mubr.bf16.gmra.mrb[4].mxu0 %v4177_v19 }
  0x74   :  { %458 = vmatprep.mubr.bf16.mxu0 %v4179_v20 }
  0x7b   :  { %459 = vmatmul.mubr.bf16.gmra.mrb[8].mxu0 %v4183_v24 }
  0x7c   :  { %466 = vmatprep.mubr.bf16.mxu0 %v4185_v25 }
  0x83   :  { %467 = vmatmul.mubr.bf16.gmra.mrb[12].mxu0 %v4189_v26 }
  0x84   :  { %474 = vmatprep.mubr.bf16.mxu0 %v4191_v27 }
  0x8b   :  { %475 = vmatmul.mubr.bf16.gmra.mrb[16].mxu0 %v4195_v28 }
  0x8c   :  { %482 = vmatprep.mubr.bf16.mxu0 %v4197_v29 }
  0x93   :  { %483 = vmatmul.mubr.bf16.gmra.mrb[20].mxu0 %v4201_v30 }
  0x94   :  { %490 = vmatprep.mubr.bf16.mxu0 %v4203_v31 }
  0x9b   :  { %491 = vmatmul.mubr.bf16.gmra.mrb[24].mxu0 %v4207_v32 }
  0x9c   :  { %498 = vmatprep.mubr.bf16.mxu0 %v4209_v33 }
  0xa3   :  { %499 = vmatmul.mubr.bf16.gmra.mrb[28].mxu0 %v4213_v34 }
  0xa4   :  { %506 = vmatprep.mubr.bf16.mxu0 %v4215_v35 }
  0xab   :  { %507 = vmatmul.mubr.bf16.gmra.mrb[32].mxu0 %v4219_v36 }
  0xac   :  { %514 = vmatprep.mubr.bf16.mxu0 %v4221_v37 }
  0xb3   :  { %515 = vmatmul.mubr.bf16.gmra.mrb[36].mxu0 %v4225_v38 }
  0xb4   :  { %522 = vmatprep.mubr.bf16.mxu0 %v4227_v39 }
  0xbb   :  { %523 = vmatmul.mubr.bf16.gmra.mrb[40].mxu0 %v4231_v40 }
  0xbc   :  { %530 = vmatprep.mubr.bf16.mxu0 %v4233_v41 }
  0xc3   :  { %531 = vmatmul.mubr.bf16.gmra.mrb[44].mxu0 %v4237_v43 }
  0xc4   :  { %538 = vmatprep.mubr.bf16.mxu0 %v4239_v44 }
  0xcb   :  { %539 = vmatmul.mubr.bf16.gmra.mrb[48].mxu0 %v4243_v47 }
  0xcc   :  { %546 = vmatprep.mubr.bf16.mxu0 %v4245_v48 }
  0xd3   :  { %547 = vmatmul.mubr.bf16.gmra.mrb[52].mxu0 %v4249_v51 }
  0xd4   :  { %554 = vmatprep.mubr.bf16.mxu0 %v4251_v52 }
  0xdb   :  { %555 = vmatmul.mubr.bf16.gmra.mrb[56].mxu0 %v4255_v53 }
  0xdc   :  { %562 = vmatprep.mubr.bf16.mxu0 %v4257_v54 }
  0xe3   :  { %563 = vmatmul.mubr.bf16.gmra.mrb[60].mxu0 %v4261_v55 }
 0x13e   :  { %v3079_v56 = vpop.f32.mrb[0].mxu0 }
 0x13f   :  { %v3080_v57 = vpop.f32.mrb[1].mxu0 }
 0x140   :  { %v3081_v59 = vadd.f32 %v3080_v57, %v3079_v56  ;;  %v3082_v60 = vpop.f32.mrb[2].mxu0 }
 0x141   :  { %v3083_v61 = vpop.f32.mrb[3].mxu0 }
 0x142   :  { %v3084_v62 = vadd.f32 %v3083_v61, %v3082_v60  ;;  %v445_v63 = vadd.f32 %v3081_v59, %v4267_v58 }
 0x144   :  { %v448_v0 = vadd.f32 %v3084_v62, %v4267_v58  ;;  %v571_v2 = vmax.f32 %v445_v63, 0.0 }
 0x146   :  { %v3085_v1 = vpop.f32.mrb[4].mxu0  ;;  %v572_v3 = vmax.f32 %v448_v0, 0.0 }
 0x147   :  { %v3086_v4 = vpop.f32.mrb[5].mxu0 }
 0x148   :  { %v3087_v5 = vadd.f32 %v3086_v4, %v3085_v1  ;;  %v3088_v6 = vpop.f32.mrb[6].mxu0  ;;  %v603_v7 = vpack.c.bf16 %v572_v3, %v571_v2 }
 0x149   :  { %v3089_v8 = vpop.f32.mrb[7].mxu0 }
 0x14a   :  { %v453_v9 = vadd.f32 %v3087_v5, %v4267_v58  ;;  %v3090_v10 = vadd.f32 %v3089_v8, %v3088_v6  ;;  %3630 = vmatprep.mubr.bf16.mxu1 %v603_v7 }
 0x14c   :  { %v456_v12 = vadd.f32 %v3090_v10, %v4267_v58  ;;  %v573_v13 = vmax.f32 %v453_v9, 0.0 }
 0x14e   :  { %v574_v14 = vmax.f32 %v456_v12, 0.0  ;;  %v3091_v15 = vpop.f32.mrb[8].mxu0 }
 0x14f   :  { %v3092_v16 = vpop.f32.mrb[9].mxu0 }
 0x150   :  { %v3093_v21 = vadd.f32 %v3092_v16, %v3091_v15  ;;  %v3094_v22 = vpop.f32.mrb[10].mxu0  ;;  %v604_v23 = vpack.c.bf16 %v574_v14, %v573_v13 }
 0x151   :  { %v3095_v42 = vpop.f32.mrb[11].mxu0 }
 0x152   :  { %v461_v45 = vadd.f32 %v3093_v21, %v4267_v58  ;;  %v3096_v46 = vadd.f32 %v3095_v42, %v3094_v22  ;;  %3631 = vmatmul.mubr.bf16.vlgmr.msra.gmra.mrb[0].mxu1 %v604_v23 }
 0x154   :  { %v464_v49 = vadd.f32 %v3096_v46, %v4267_v58  ;;  %v575_v50 = vmax.f32 %v461_v45, 0.0 }
 0x156   :  { %v576_v56 = vmax.f32 %v464_v49, 0.0  ;;  %v3097_v57 = vpop.f32.mrb[12].mxu0 }
 0x157   :  { %v3098_v59 = vpop.f32.mrb[13].mxu0 }
 0x158   :  { %v3099_v60 = vadd.f32 %v3098_v59, %v3097_v57  ;;  %v3100_v61 = vpop.f32.mrb[14].mxu0  ;;  %v605_v62 = vpack.c.bf16 %v576_v56, %v575_v50 }
 0x159   :  { %v3101_v63 = vpop.f32.mrb[15].mxu0 }
 0x15a   :  { %v469_v0 = vadd.f32 %v3099_v60, %v4267_v58  ;;  %v3102_v1 = vadd.f32 %v3101_v63, %v3100_v61  ;;  %3634 = vmatprep.mubr.bf16.mxu1 %v605_v62 }
 0x15c   :  { %v472_v2 = vadd.f32 %v3102_v1, %v4267_v58  ;;  %v577_v3 = vmax.f32 %v469_v0, 0.0 }
 0x15e   :  { %v578_v4 = vmax.f32 %v472_v2, 0.0  ;;  %v3103_v5 = vpop.f32.mrb[16].mxu0 }
 0x15f   :  { %v3104_v6 = vpop.f32.mrb[17].mxu0 }
 0x160   :  { %v3105_v7 = vadd.f32 %v3104_v6, %v3103_v5  ;;  %v3106_v8 = vpop.f32.mrb[18].mxu0  ;;  %v606_v9 = vpack.c.bf16 %v578_v4, %v577_v3 }
 0x161   :  { %v3107_v10 = vpop.f32.mrb[19].mxu0 }
 0x162   :  { %v477_v12 = vadd.f32 %v3105_v7, %v4267_v58  ;;  %v3108_v13 = vadd.f32 %v3107_v10, %v3106_v8  ;;  %3635 = vmatmul.mubr.bf16.gmra.mrb[4].mxu1 %v606_v9 }
 0x164   :  { %v480_v14 = vadd.f32 %v3108_v13, %v4267_v58  ;;  %v579_v15 = vmax.f32 %v477_v12, 0.0 }
 0x166   :  { %v580_v16 = vmax.f32 %v480_v14, 0.0  ;;  %v3109_v21 = vpop.f32.mrb[20].mxu0 }
 0x167   :  { %v3110_v22 = vpop.f32.mrb[21].mxu0 }
 0x168   :  { %v3111_v23 = vadd.f32 %v3110_v22, %v3109_v21  ;;  %v3112_v42 = vpop.f32.mrb[22].mxu0  ;;  %v607_v45 = vpack.c.bf16 %v580_v16, %v579_v15 }
 0x169   :  { %v3113_v46 = vpop.f32.mrb[23].mxu0 }
 0x16a   :  { %v485_v49 = vadd.f32 %v3111_v23, %v4267_v58  ;;  %v3114_v50 = vadd.f32 %v3113_v46, %v3112_v42  ;;  %3638 = vmatprep.mubr.bf16.mxu1 %v607_v45 }
 0x16c   :  { %v488_v56 = vadd.f32 %v3114_v50, %v4267_v58  ;;  %v581_v57 = vmax.f32 %v485_v49, 0.0 }
 0x16e   :  { %v582_v59 = vmax.f32 %v488_v56, 0.0  ;;  %v3115_v60 = vpop.f32.mrb[24].mxu0 }
 0x16f   :  { %v3116_v61 = vpop.f32.mrb[25].mxu0 }
 0x170   :  { %v3117_v62 = vadd.f32 %v3116_v61, %v3115_v60  ;;  %v3118_v63 = vpop.f32.mrb[26].mxu0  ;;  %v608_v0 = vpack.c.bf16 %v582_v59, %v581_v57 }
 0x171   :  { %v3119_v1 = vpop.f32.mrb[27].mxu0 }
 0x172   :  { %v493_v2 = vadd.f32 %v3117_v62, %v4267_v58  ;;  %v3120_v3 = vadd.f32 %v3119_v1, %v3118_v63  ;;  %3639 = vmatmul.mubr.bf16.gmra.mrb[8].mxu1 %v608_v0 }
 0x174   :  { %v496_v4 = vadd.f32 %v3120_v3, %v4267_v58  ;;  %v583_v5 = vmax.f32 %v493_v2, 0.0 }
 0x176   :  { %v584_v6 = vmax.f32 %v496_v4, 0.0  ;;  %v3121_v7 = vpop.f32.mrb[28].mxu0 }
 0x177   :  { %v3122_v8 = vpop.f32.mrb[29].mxu0 }
 0x178   :  { %v3123_v9 = vadd.f32 %v3122_v8, %v3121_v7  ;;  %v3124_v10 = vpop.f32.mrb[30].mxu0  ;;  %v609_v12 = vpack.c.bf16 %v584_v6, %v583_v5 }
 0x179   :  { %v3125_v13 = vpop.f32.mrb[31].mxu0 }
 0x17a   :  { %v501_v14 = vadd.f32 %v3123_v9, %v4267_v58  ;;  %v3126_v15 = vadd.f32 %v3125_v13, %v3124_v10  ;;  %3642 = vmatprep.mubr.bf16.mxu1 %v609_v12 }
 0x17c   :  { %v504_v16 = vadd.f32 %v3126_v15, %v4267_v58  ;;  %v585_v21 = vmax.f32 %v501_v14, 0.0 }
 0x17e   :  { %v586_v22 = vmax.f32 %v504_v16, 0.0  ;;  %v3127_v23 = vpop.f32.mrb[32].mxu0 }
 0x17f   :  { %v3128_v42 = vpop.f32.mrb[33].mxu0 }
 0x180   :  { %v3129_v45 = vadd.f32 %v3128_v42, %v3127_v23  ;;  %v3130_v46 = vpop.f32.mrb[34].mxu0  ;;  %v610_v49 = vpack.c.bf16 %v586_v22, %v585_v21 }
 0x181   :  { %v3131_v50 = vpop.f32.mrb[35].mxu0 }
 0x182   :  { %v509_v56 = vadd.f32 %v3129_v45, %v4267_v58  ;;  %v3132_v57 = vadd.f32 %v3131_v50, %v3130_v46  ;;  %3643 = vmatmul.mubr.bf16.gmra.mrb[12].mxu1 %v610_v49 }
 0x184   :  { %v512_v59 = vadd.f32 %v3132_v57, %v4267_v58  ;;  %v587_v60 = vmax.f32 %v509_v56, 0.0 }
 0x186   :  { %v588_v61 = vmax.f32 %v512_v59, 0.0  ;;  %v3133_v62 = vpop.f32.mrb[36].mxu0 }
 0x187   :  { %v3134_v63 = vpop.f32.mrb[37].mxu0 }
 0x188   :  { %v3135_v0 = vadd.f32 %v3134_v63, %v3133_v62  ;;  %v3136_v1 = vpop.f32.mrb[38].mxu0  ;;  %v611_v2 = vpack.c.bf16 %v588_v61, %v587_v60 }
 0x189   :  { %v3137_v3 = vpop.f32.mrb[39].mxu0 }
 0x18a   :  { %v517_v4 = vadd.f32 %v3135_v0, %v4267_v58  ;;  %v3138_v5 = vadd.f32 %v3137_v3, %v3136_v1  ;;  %3646 = vmatprep.mubr.bf16.mxu1 %v611_v2 }
 0x18c   :  { %v520_v6 = vadd.f32 %v3138_v5, %v4267_v58  ;;  %v589_v7 = vmax.f32 %v517_v4, 0.0 }
 0x18e   :  { %v590_v8 = vmax.f32 %v520_v6, 0.0  ;;  %v3139_v9 = vpop.f32.mrb[40].mxu0 }
 0x18f   :  { %v3140_v10 = vpop.f32.mrb[41].mxu0 }
 0x190   :  { %v3141_v12 = vadd.f32 %v3140_v10, %v3139_v9  ;;  %v3142_v13 = vpop.f32.mrb[42].mxu0  ;;  %v612_v14 = vpack.c.bf16 %v590_v8, %v589_v7 }
 0x191   :  { %v3143_v15 = vpop.f32.mrb[43].mxu0 }
 0x192   :  { %v525_v16 = vadd.f32 %v3141_v12, %v4267_v58  ;;  %v3144_v21 = vadd.f32 %v3143_v15, %v3142_v13  ;;  %3647 = vmatmul.mubr.bf16.gmra.mrb[16].mxu1 %v612_v14 }
 0x194   :  { %v528_v22 = vadd.f32 %v3144_v21, %v4267_v58  ;;  %v591_v23 = vmax.f32 %v525_v16, 0.0 }
 0x196   :  { %v592_v42 = vmax.f32 %v528_v22, 0.0  ;;  %v3145_v45 = vpop.f32.mrb[44].mxu0 }
 0x197   :  { %v3146_v46 = vpop.f32.mrb[45].mxu0 }
 0x198   :  { %v3147_v49 = vadd.f32 %v3146_v46, %v3145_v45  ;;  %v3148_v50 = vpop.f32.mrb[46].mxu0  ;;  %v613_v56 = vpack.c.bf16 %v592_v42, %v591_v23 }
 0x199   :  { %v3149_v57 = vpop.f32.mrb[47].mxu0 }
 0x19a   :  { %v533_v59 = vadd.f32 %v3147_v49, %v4267_v58  ;;  %v3150_v60 = vadd.f32 %v3149_v57, %v3148_v50  ;;  %3650 = vmatprep.mubr.bf16.mxu1 %v613_v56 }
 0x19c   :  { %v536_v61 = vadd.f32 %v3150_v60, %v4267_v58  ;;  %v593_v62 = vmax.f32 %v533_v59, 0.0 }
 0x19e   :  { %v594_v63 = vmax.f32 %v536_v61, 0.0  ;;  %v3151_v0 = vpop.f32.mrb[48].mxu0 }
 0x19f   :  { %v3152_v1 = vpop.f32.mrb[49].mxu0 }
 0x1a0   :  { %v3153_v2 = vadd.f32 %v3152_v1, %v3151_v0  ;;  %v3154_v3 = vpop.f32.mrb[50].mxu0  ;;  %v614_v4 = vpack.c.bf16 %v594_v63, %v593_v62 }
 0x1a1   :  { %v3155_v5 = vpop.f32.mrb[51].mxu0 }
 0x1a2   :  { %v541_v6 = vadd.f32 %v3153_v2, %v4267_v58  ;;  %v3156_v7 = vadd.f32 %v3155_v5, %v3154_v3  ;;  %3651 = vmatmul.mubr.bf16.gmra.mrb[20].mxu1 %v614_v4 }
 0x1a4   :  { %v544_v8 = vadd.f32 %v3156_v7, %v4267_v58  ;;  %v595_v9 = vmax.f32 %v541_v6, 0.0 }
 0x1a6   :  { %v596_v10 = vmax.f32 %v544_v8, 0.0  ;;  %v3157_v12 = vpop.f32.mrb[52].mxu0 }
 0x1a7   :  { %v3158_v13 = vpop.f32.mrb[53].mxu0 }
 0x1a8   :  { %v3159_v14 = vadd.f32 %v3158_v13, %v3157_v12  ;;  %v3160_v15 = vpop.f32.mrb[54].mxu0  ;;  %v615_v16 = vpack.c.bf16 %v596_v10, %v595_v9 }
 0x1a9   :  { %v3161_v21 = vpop.f32.mrb[55].mxu0 }
 0x1aa   :  { %v549_v22 = vadd.f32 %v3159_v14, %v4267_v58  ;;  %v3162_v23 = vadd.f32 %v3161_v21, %v3160_v15  ;;  %3654 = vmatprep.mubr.bf16.mxu1 %v615_v16 }
 0x1ac   :  { %v552_v42 = vadd.f32 %v3162_v23, %v4267_v58  ;;  %v597_v45 = vmax.f32 %v549_v22, 0.0 }
 0x1ae   :  { %v598_v46 = vmax.f32 %v552_v42, 0.0  ;;  %v3163_v49 = vpop.f32.mrb[56].mxu0 }
 0x1af   :  { %v3164_v50 = vpop.f32.mrb[57].mxu0 }
 0x1b0   :  { %v3165_v56 = vadd.f32 %v3164_v50, %v3163_v49  ;;  %v3166_v57 = vpop.f32.mrb[58].mxu0  ;;  %v616_v59 = vpack.c.bf16 %v598_v46, %v597_v45 }
 0x1b1   :  { %v3167_v60 = vpop.f32.mrb[59].mxu0 }
 0x1b2   :  { %v557_v61 = vadd.f32 %v3165_v56, %v4267_v58  ;;  %v3168_v62 = vadd.f32 %v3167_v60, %v3166_v57  ;;  %3655 = vmatmul.mubr.bf16.gmra.mrb[24].mxu1 %v616_v59 }
 0x1b4   :  { %v560_v63 = vadd.f32 %v3168_v62, %v4267_v58  ;;  %v599_v0 = vmax.f32 %v557_v61, 0.0 }
 0x1b6   :  { %v600_v1 = vmax.f32 %v560_v63, 0.0  ;;  %v3169_v2 = vpop.f32.mrb[60].mxu0 }
 0x1b7   :  { %v3170_v3 = vpop.f32.mrb[61].mxu0 }
 0x1b8   :  { %v3171_v4 = vadd.f32 %v3170_v3, %v3169_v2  ;;  %v3172_v5 = vpop.f32.mrb[62].mxu0  ;;  %v617_v6 = vpack.c.bf16 %v600_v1, %v599_v0 }
 0x1b9   :  { %v3173_v7 = vpop.f32.mrb[63].mxu0 }
 0x1ba   :  { %v565_v8 = vadd.f32 %v3171_v4, %v4267_v58  ;;  %v3174_v9 = vadd.f32 %v3173_v7, %v3172_v5  ;;  %3658 = vmatprep.mubr.bf16.mxu1 %v617_v6 }
 0x1bc   :  { %v568_v10 = vadd.f32 %v3174_v9, %v4267_v58  ;;  %v601_v12 = vmax.f32 %v565_v8, 0.0 }
 0x1be   :  { %v602_v13 = vmax.f32 %v568_v10, 0.0 }
 0x1c0   :  { %v618_v14 = vpack.c.bf16 %v602_v13, %v601_v12 }
 0x1c2   :  { %3659 = vmatmul.mubr.bf16.gmra.mrb[28].mxu1 %v618_v14 }
 0x1c3   :  { %1124 = vmatprep.mubr.bf16.mxu1 %v4168_v11 }
 0x225   :  { %v3632_v15 = vpop.f32.mrb[0].mxu1 }
 0x226   :  { %v749_v16 = vpop.f32.mrb[1].mxu1 }
 0x227   :  { %v3633_v21 = vpop.f32.mrb[2].mxu1 }
 0x228   :  { %v877_v22 = vpack.c.bf16 %v3633_v21, %v3632_v15  ;;  %v752_v23 = vpop.f32.mrb[3].mxu1 }
 0x229   :  { %v876_v42 = vpack.c.bf16 %v752_v23, %v749_v16 }
 0x235   :  { %v3636_v45 = vpop.f32.mrb[4].mxu1 }
 0x236   :  { %v765_v46 = vpop.f32.mrb[5].mxu1 }
 0x237   :  { %v3637_v49 = vpop.f32.mrb[6].mxu1 }
 0x238   :  { %v879_v50 = vpack.c.bf16 %v3637_v49, %v3636_v45  ;;  %v768_v56 = vpop.f32.mrb[7].mxu1 }
 0x239   :  { %v878_v57 = vpack.c.bf16 %v768_v56, %v765_v46 }
 0x245   :  { %v3640_v59 = vpop.f32.mrb[8].mxu1 }
 0x246   :  { %v781_v58 = vpop.f32.mrb[9].mxu1 }
 0x247   :  { %v3641_v60 = vpop.f32.mrb[10].mxu1 }
 0x248   :  { %v881_v61 = vpack.c.bf16 %v3641_v60, %v3640_v59  ;;  %v784_v62 = vpop.f32.mrb[11].mxu1 }
 0x249   :  { %v880_v63 = vpack.c.bf16 %v784_v62, %v781_v58 }
 0x255   :  { %v3644_v0 = vpop.f32.mrb[12].mxu1 }
 0x256   :  { %v797_v11 = vpop.f32.mrb[13].mxu1 }
 0x257   :  { %v3645_v1 = vpop.f32.mrb[14].mxu1 }
 0x258   :  { %v883_v2 = vpack.c.bf16 %v3645_v1, %v3644_v0  ;;  %v800_v3 = vpop.f32.mrb[15].mxu1 }
 0x259   :  { %v882_v4 = vpack.c.bf16 %v800_v3, %v797_v11  ;;  %v3862_v11 = vld [vmem:[#allocation8 + $0x48] sm:$0xff]  }
 0x265   :  { %v3648_v5 = vpop.f32.mrb[16].mxu1 }
 0x266   :  { %v813_v6 = vpop.f32.mrb[17].mxu1 }
 0x267   :  { %v3649_v7 = vpop.f32.mrb[18].mxu1 }
 0x268   :  { %v885_v8 = vpack.c.bf16 %v3649_v7, %v3648_v5  ;;  %v816_v9 = vpop.f32.mrb[19].mxu1 }
 0x269   :  { %v884_v10 = vpack.c.bf16 %v816_v9, %v813_v6 }
 0x26b   :  { %3199 = vmatprep.subr.bf16.mxu1 %v884_v10 }
 0x26c   :  { %3200 = vmatpush3.bf16.msra.mxu1 %v876_v42 }
 0x26d   :  { %3201 = vmatprep.subr.bf16.mxu1 %v885_v8 }
 0x270   :  { %3202 = vmatpush3.bf16.msra.mxu1 %v877_v22 }
 0x275   :  { %v3652_v12 = vpop.f32.mrb[20].mxu1 }
 0x276   :  { %v829_v13 = vpop.f32.mrb[21].mxu1 }
 0x277   :  { %v3653_v14 = vpop.f32.mrb[22].mxu1 }
 0x278   :  { %v887_v15 = vpack.c.bf16 %v3653_v14, %v3652_v12  ;;  %v832_v16 = vpop.f32.mrb[23].mxu1 }
 0x279   :  { %v886_v21 = vpack.c.bf16 %v832_v16, %v829_v13 }
 0x27b   :  { %3203 = vmatprep.subr.bf16.mxu1 %v886_v21 }
 0x27c   :  { %3204 = vmatpush3.bf16.msra.mxu1 %v878_v57  ;;  %v3861_v57 = vld [vmem:[#allocation8 + $0x40] sm:$0xff]  }
 0x27d   :  { %3205 = vmatprep.subr.bf16.mxu1 %v887_v15  ;;  %3662 = vmatprep.subr.bf16.mxu0 %v3861_v57 }
 0x27e   :  { %3663 = vmatpush3.bf16.msra.mxu0 %v3861_v57 }
 0x27f   :  { %3664 = vmatprep.subr.bf16.mxu0 %v3862_v11 }
 0x280   :  { %3206 = vmatpush3.bf16.msra.mxu1 %v879_v50  ;;  %v3863_v50 = vld [vmem:[#allocation8 + $0x50] sm:$0xff]  }
 0x282   :  { %3665 = vmatpush3.bf16.msra.mxu0 %v3862_v11 }
 0x283   :  { %3666 = vmatprep.subr.bf16.mxu0 %v3863_v50 }
 0x285   :  { %v3656_v23 = vpop.f32.mrb[24].mxu1 }
 0x286   :  { %v845_v45 = vpop.f32.mrb[25].mxu1  ;;  %3667 = vmatpush3.bf16.msra.mxu0 %v3863_v50 }
 0x287   :  { %v3657_v46 = vpop.f32.mrb[26].mxu1 }
 0x288   :  { %v889_v49 = vpack.c.bf16 %v3657_v46, %v3656_v23  ;;  %v848_v56 = vpop.f32.mrb[27].mxu1 }
 0x289   :  { %v888_v59 = vpack.c.bf16 %v848_v56, %v845_v45 }
 0x28b   :  { %3207 = vmatprep.subr.bf16.mxu1 %v888_v59 }
 0x28c   :  { %3208 = vmatpush3.bf16.msra.mxu1 %v880_v63 }
 0x28d   :  { %3209 = vmatprep.subr.bf16.mxu1 %v889_v49 }
 0x290   :  { %3210 = vmatpush3.bf16.msra.mxu1 %v881_v61 }
 0x295   :  { %v3660_v22 = vpop.f32.mrb[28].mxu1 }
 0x296   :  { %v861_v42 = vpop.f32.mrb[29].mxu1 }
 0x297   :  { %v3661_v58 = vpop.f32.mrb[30].mxu1 }
 0x298   :  { %v891_v60 = vpack.c.bf16 %v3661_v58, %v3660_v22  ;;  %v864_v62 = vpop.f32.mrb[31].mxu1 }
 0x299   :  { %v890_v0 = vpack.c.bf16 %v864_v62, %v861_v42 }
 0x29b   :  { %3211 = vmatprep.subr.bf16.mxu1 %v890_v0 }
 0x29c   :  { %3212 = vmatpush3.bf16.msra.mxu1 %v882_v4 }
 0x29d   :  { %3213 = vmatprep.subr.bf16.mxu1 %v891_v60 }
 0x2a0   :  { %3214 = vmatpush3.bf16.msra.mxu1 %v883_v2 }
 0x2a3   :  { %1125 = vmatmul.mubr.bf16.vlgmr.msra.gmra.mrb[32].mxu1 %v4171_v17  ;;  %v3864_v17 = vld [vmem:[#allocation8 + $0x58] sm:$0xff]  }
 0x2a4   :  { %1132 = vmatprep.mubr.bf16.mxu1 %v4173_v18  ;;  %3668 = vmatprep.subr.bf16.mxu0 %v3864_v17  ;;  %v3865_v18 = vld [vmem:[#allocation8 + $0x60] sm:$0xff]  }
 0x2a5   :  { %3669 = vmatpush3.bf16.msra.mxu0 %v3864_v17 }
 0x2a6   :  { %3670 = vmatprep.subr.bf16.mxu0 %v3865_v18 }
 0x2a9   :  { %3671 = vmatpush3.bf16.msra.mxu0 %v3865_v18 }
 0x2ab   :  { %1133 = vmatmul.mubr.bf16.gmra.mrb[36].mxu1 %v4177_v19  ;;  %v3866_v19 = vld [vmem:[#allocation8 + $0x68] sm:$0xff]  }
 0x2ac   :  { %1140 = vmatprep.mubr.bf16.mxu1 %v4179_v20  ;;  %3672 = vmatprep.subr.bf16.mxu0 %v3866_v19  ;;  %v3867_v20 = vld [vmem:[#allocation8 + $0x70] sm:$0xff]  }
 0x2ad   :  { %3673 = vmatpush3.bf16.msra.mxu0 %v3866_v19 }
 0x2ae   :  { %3674 = vmatprep.subr.bf16.mxu0 %v3867_v20 }
 0x2b1   :  { %3675 = vmatpush3.bf16.msra.mxu0 %v3867_v20 }
 0x2b3   :  { %1141 = vmatmul.mubr.bf16.gmra.mrb[40].mxu1 %v4183_v24  ;;  %v3868_v24 = vld [vmem:[#allocation8 + $0x78] sm:$0xff]  }
 0x2b4   :  { %1148 = vmatprep.mubr.bf16.mxu1 %v4185_v25  ;;  %3676 = vmatprep.subr.bf16.mxu0 %v3868_v24 }
 0x2b5   :  { %3677 = vmatpush3.bf16.msra.mxu0 %v3868_v24 }
 0x2bb   :  { %1149 = vmatmul.mubr.bf16.gmra.mrb[44].mxu1 %v4189_v26  ;;  %v4336_v26 = vld [vmem:[%s4623_s3 + $0x1] ss:$0 sm:$0xff] }
 0x2bc   :  { %1156 = vmatprep.mubr.bf16.mxu1 %v4191_v27 }
 0x2c3   :  { %1157 = vmatmul.mubr.bf16.gmra.mrb[48].mxu1 %v4195_v28 }
 0x2c4   :  { %1164 = vmatprep.mubr.bf16.mxu1 %v4197_v29 }
 0x2cb   :  { %1165 = vmatmul.mubr.bf16.gmra.mrb[52].mxu1 %v4201_v30 }
 0x2cc   :  { %1172 = vmatprep.mubr.bf16.mxu1 %v4203_v31 }
 0x2d3   :  { %1173 = vmatmul.mubr.bf16.gmra.mrb[56].mxu1 %v4207_v32 }
 0x2d4   :  { %1180 = vmatprep.mubr.bf16.mxu1 %v4209_v33 }
 0x2db   :  { %1181 = vmatmul.mubr.bf16.gmra.mrb[60].mxu1 %v4213_v34 }
 0x2dc   :  { %1188 = vmatprep.mubr.bf16.mxu1 %v4215_v35 }
 0x2e3   :  { %1189 = vmatmul.mubr.bf16.gmra.mrb[64].mxu1 %v4219_v36 }
 0x2e4   :  { %1196 = vmatprep.mubr.bf16.mxu1 %v4221_v37 }
 0x2eb   :  { %1197 = vmatmul.mubr.bf16.gmra.mrb[68].mxu1 %v4225_v38 }
 0x2ec   :  { %1204 = vmatprep.mubr.bf16.mxu1 %v4227_v39 }
 0x2f3   :  { %1205 = vmatmul.mubr.bf16.gmra.mrb[72].mxu1 %v4231_v40 }
 0x2f4   :  { %1212 = vmatprep.mubr.bf16.mxu1 %v4233_v41 }
 0x2fb   :  { %1213 = vmatmul.mubr.bf16.gmra.mrb[76].mxu1 %v4237_v43 }
 0x2fc   :  { %1220 = vmatprep.mubr.bf16.mxu1 %v4239_v44 }
 0x303   :  { %1221 = vmatmul.mubr.bf16.gmra.mrb[80].mxu1 %v4243_v47 }
 0x304   :  { %1228 = vmatprep.mubr.bf16.mxu1 %v4245_v48 }
 0x30b   :  { %1229 = vmatmul.mubr.bf16.gmra.mrb[84].mxu1 %v4249_v51 }
 0x30c   :  { %1236 = vmatprep.mubr.bf16.mxu1 %v4251_v52 }
 0x313   :  { %1237 = vmatmul.mubr.bf16.gmra.mrb[88].mxu1 %v4255_v53 }
 0x314   :  { %1244 = vmatprep.mubr.bf16.mxu1 %v4257_v54 }
 0x31b   :  { %1245 = vmatmul.mubr.bf16.gmra.mrb[92].mxu1 %v4261_v55 }
 0x376   :  { %v3215_v25 = vpop.f32.mrb[32].mxu1 }
 0x377   :  { %v3216_v27 = vpop.f32.mrb[33].mxu1 }
 0x378   :  { %v3217_v28 = vadd.f32 %v3216_v27, %v3215_v25  ;;  %v3218_v29 = vpop.f32.mrb[34].mxu1 }
 0x379   :  { %v3219_v30 = vpop.f32.mrb[35].mxu1 }
 0x37a   :  { %v1127_v31 = vadd.f32 %v3217_v28, %v4336_v26  ;;  %v3220_v32 = vadd.f32 %v3219_v30, %v3218_v29 }
 0x37c   :  { %v1130_v33 = vadd.f32 %v3220_v32, %v4336_v26  ;;  %v1253_v34 = vmax.f32 %v1127_v31, 0.0 }
 0x37e   :  { %v1254_v35 = vmax.f32 %v1130_v33, 0.0  ;;  %v3221_v36 = vpop.f32.mrb[36].mxu1 }
 0x37f   :  { %v3222_v37 = vpop.f32.mrb[37].mxu1 }
 0x380   :  { %v3223_v38 = vadd.f32 %v3222_v37, %v3221_v36  ;;  %v3224_v39 = vpop.f32.mrb[38].mxu1  ;;  %v1285_v40 = vpack.c.bf16 %v1254_v35, %v1253_v34 }
 0x381   :  { %v3225_v41 = vpop.f32.mrb[39].mxu1 }
 0x382   :  { %v1135_v43 = vadd.f32 %v3223_v38, %v4336_v26  ;;  %v3226_v44 = vadd.f32 %v3225_v41, %v3224_v39  ;;  %3678 = vmatprep.mubr.bf16.mxu0 %v1285_v40 }
 0x384   :  { %v1138_v47 = vadd.f32 %v3226_v44, %v4336_v26  ;;  %v1255_v48 = vmax.f32 %v1135_v43, 0.0 }
 0x386   :  { %v1256_v51 = vmax.f32 %v1138_v47, 0.0  ;;  %v3227_v52 = vpop.f32.mrb[40].mxu1 }
 0x387   :  { %v3228_v53 = vpop.f32.mrb[41].mxu1 }
 0x388   :  { %v1286_v54 = vpack.c.bf16 %v1256_v51, %v1255_v48  ;;  %v3229_v55 = vadd.f32 %v3228_v53, %v3227_v52  ;;  %v3230_v61 = vpop.f32.mrb[42].mxu1 }
 0x389   :  { %v3231_v63 = vpop.f32.mrb[43].mxu1 }
 0x38a   :  { %v1143_v1 = vadd.f32 %v3229_v55, %v4336_v26  ;;  %v3232_v2 = vadd.f32 %v3231_v63, %v3230_v61  ;;  %3679 = vmatmul.mubr.bf16.vlgmr.msra.gmra.mrb[64].mxu0 %v1286_v54 }
 0x38c   :  { %v1146_v3 = vadd.f32 %v3232_v2, %v4336_v26  ;;  %v1257_v4 = vmax.f32 %v1143_v1, 0.0 }
 0x38e   :  { %v1258_v5 = vmax.f32 %v1146_v3, 0.0  ;;  %v3233_v6 = vpop.f32.mrb[44].mxu1 }
 0x38f   :  { %v3234_v7 = vpop.f32.mrb[45].mxu1 }
 0x390   :  { %v3235_v8 = vadd.f32 %v3234_v7, %v3233_v6  ;;  %v3236_v9 = vpop.f32.mrb[46].mxu1  ;;  %v1287_v10 = vpack.c.bf16 %v1258_v5, %v1257_v4 }
 0x391   :  { %v3237_v12 = vpop.f32.mrb[47].mxu1 }
 0x392   :  { %v1151_v13 = vadd.f32 %v3235_v8, %v4336_v26  ;;  %v3238_v14 = vadd.f32 %v3237_v12, %v3236_v9  ;;  %3682 = vmatprep.mubr.bf16.mxu0 %v1287_v10 }
 0x394   :  { %v1154_v15 = vadd.f32 %v3238_v14, %v4336_v26  ;;  %v1259_v16 = vmax.f32 %v1151_v13, 0.0 }
 0x396   :  { %v1260_v21 = vmax.f32 %v1154_v15, 0.0  ;;  %v3239_v23 = vpop.f32.mrb[48].mxu1 }
 0x397   :  { %v3240_v45 = vpop.f32.mrb[49].mxu1 }
 0x398   :  { %v3241_v46 = vadd.f32 %v3240_v45, %v3239_v23  ;;  %v3242_v49 = vpop.f32.mrb[50].mxu1  ;;  %v1288_v56 = vpack.c.bf16 %v1260_v21, %v1259_v16 }
 0x399   :  { %v3243_v59 = vpop.f32.mrb[51].mxu1 }
 0x39a   :  { %v1159_v22 = vadd.f32 %v3241_v46, %v4336_v26  ;;  %v3244_v42 = vadd.f32 %v3243_v59, %v3242_v49  ;;  %3683 = vmatmul.mubr.bf16.gmra.mrb[68].mxu0 %v1288_v56 }
 0x39c   :  { %v1162_v58 = vadd.f32 %v3244_v42, %v4336_v26  ;;  %v1261_v60 = vmax.f32 %v1159_v22, 0.0 }
 0x39e   :  { %v1262_v62 = vmax.f32 %v1162_v58, 0.0  ;;  %v3245_v0 = vpop.f32.mrb[52].mxu1 }
 0x39f   :  { %v3246_v57 = vpop.f32.mrb[53].mxu1 }
 0x3a0   :  { %v3247_v11 = vadd.f32 %v3246_v57, %v3245_v0  ;;  %v3248_v50 = vpop.f32.mrb[54].mxu1  ;;  %v1289_v17 = vpack.c.bf16 %v1262_v62, %v1261_v60 }
 0x3a1   :  { %v3249_v18 = vpop.f32.mrb[55].mxu1 }
 0x3a2   :  { %v1167_v19 = vadd.f32 %v3247_v11, %v4336_v26  ;;  %v3250_v20 = vadd.f32 %v3249_v18, %v3248_v50  ;;  %3686 = vmatprep.mubr.bf16.mxu0 %v1289_v17 }
 0x3a4   :  { %v1170_v24 = vadd.f32 %v3250_v20, %v4336_v26  ;;  %v1263_v25 = vmax.f32 %v1167_v19, 0.0 }
 0x3a6   :  { %v1264_v27 = vmax.f32 %v1170_v24, 0.0  ;;  %v3251_v28 = vpop.f32.mrb[56].mxu1 }
 0x3a7   :  { %v3252_v29 = vpop.f32.mrb[57].mxu1 }
 0x3a8   :  { %v3253_v30 = vadd.f32 %v3252_v29, %v3251_v28  ;;  %v3254_v31 = vpop.f32.mrb[58].mxu1  ;;  %v1290_v32 = vpack.c.bf16 %v1264_v27, %v1263_v25 }
 0x3a9   :  { %v3255_v33 = vpop.f32.mrb[59].mxu1 }
 0x3aa   :  { %v1175_v34 = vadd.f32 %v3253_v30, %v4336_v26  ;;  %v3256_v35 = vadd.f32 %v3255_v33, %v3254_v31  ;;  %3687 = vmatmul.mubr.bf16.gmra.mrb[72].mxu0 %v1290_v32 }
 0x3ac   :  { %v1178_v36 = vadd.f32 %v3256_v35, %v4336_v26  ;;  %v1265_v37 = vmax.f32 %v1175_v34, 0.0 }
 0x3ae   :  { %v1266_v38 = vmax.f32 %v1178_v36, 0.0  ;;  %v3257_v39 = vpop.f32.mrb[60].mxu1 }
 0x3af   :  { %v3258_v40 = vpop.f32.mrb[61].mxu1 }
 0x3b0   :  { %v3259_v41 = vadd.f32 %v3258_v40, %v3257_v39  ;;  %v3260_v43 = vpop.f32.mrb[62].mxu1  ;;  %v1291_v44 = vpack.c.bf16 %v1266_v38, %v1265_v37 }
 0x3b1   :  { %v3261_v47 = vpop.f32.mrb[63].mxu1 }
 0x3b2   :  { %v1183_v48 = vadd.f32 %v3259_v41, %v4336_v26  ;;  %v3262_v51 = vadd.f32 %v3261_v47, %v3260_v43  ;;  %3690 = vmatprep.mubr.bf16.mxu0 %v1291_v44 }
 0x3b4   :  { %v1186_v52 = vadd.f32 %v3262_v51, %v4336_v26  ;;  %v1267_v53 = vmax.f32 %v1183_v48, 0.0 }
 0x3b6   :  { %v1268_v54 = vmax.f32 %v1186_v52, 0.0  ;;  %v3263_v55 = vpop.f32.mrb[64].mxu1 }
 0x3b7   :  { %v3264_v61 = vpop.f32.mrb[65].mxu1 }
 0x3b8   :  { %v3265_v63 = vadd.f32 %v3264_v61, %v3263_v55  ;;  %v3266_v1 = vpop.f32.mrb[66].mxu1  ;;  %v1292_v2 = vpack.c.bf16 %v1268_v54, %v1267_v53 }
 0x3b9   :  { %v3267_v3 = vpop.f32.mrb[67].mxu1 }
 0x3ba   :  { %v1191_v4 = vadd.f32 %v3265_v63, %v4336_v26  ;;  %v3268_v5 = vadd.f32 %v3267_v3, %v3266_v1  ;;  %3691 = vmatmul.mubr.bf16.gmra.mrb[76].mxu0 %v1292_v2 }
 0x3bc   :  { %v1194_v6 = vadd.f32 %v3268_v5, %v4336_v26  ;;  %v1269_v7 = vmax.f32 %v1191_v4, 0.0 }
 0x3be   :  { %v1270_v8 = vmax.f32 %v1194_v6, 0.0  ;;  %v3269_v9 = vpop.f32.mrb[68].mxu1 }
 0x3bf   :  { %v3270_v10 = vpop.f32.mrb[69].mxu1 }
 0x3c0   :  { %v3271_v12 = vadd.f32 %v3270_v10, %v3269_v9  ;;  %v3272_v13 = vpop.f32.mrb[70].mxu1  ;;  %v1293_v14 = vpack.c.bf16 %v1270_v8, %v1269_v7 }
 0x3c1   :  { %v3273_v15 = vpop.f32.mrb[71].mxu1 }
 0x3c2   :  { %v1199_v16 = vadd.f32 %v3271_v12, %v4336_v26  ;;  %v3274_v21 = vadd.f32 %v3273_v15, %v3272_v13  ;;  %3694 = vmatprep.mubr.bf16.mxu0 %v1293_v14 }
 0x3c4   :  { %v1202_v23 = vadd.f32 %v3274_v21, %v4336_v26  ;;  %v1271_v45 = vmax.f32 %v1199_v16, 0.0 }
 0x3c6   :  { %v1272_v46 = vmax.f32 %v1202_v23, 0.0  ;;  %v3275_v49 = vpop.f32.mrb[72].mxu1 }
 0x3c7   :  { %v3276_v56 = vpop.f32.mrb[73].mxu1 }
 0x3c8   :  { %v3277_v59 = vadd.f32 %v3276_v56, %v3275_v49  ;;  %v3278_v22 = vpop.f32.mrb[74].mxu1  ;;  %v1294_v42 = vpack.c.bf16 %v1272_v46, %v1271_v45 }
 0x3c9   :  { %v3279_v58 = vpop.f32.mrb[75].mxu1 }
 0x3ca   :  { %v1207_v60 = vadd.f32 %v3277_v59, %v4336_v26  ;;  %v3280_v62 = vadd.f32 %v3279_v58, %v3278_v22  ;;  %3695 = vmatmul.mubr.bf16.gmra.mrb[80].mxu0 %v1294_v42  ;;  %v4370_v42 = vld [vmem:[#allocation3 + $0x4] ss:$8 sps:$4 sm:$0xff]  }
 0x3cc   :  { %v1210_v0 = vadd.f32 %v3280_v62, %v4336_v26  ;;  %v1273_v57 = vmax.f32 %v1207_v60, 0.0 }
 0x3ce   :  { %v1274_v11 = vmax.f32 %v1210_v0, 0.0  ;;  %v3281_v50 = vpop.f32.mrb[76].mxu1 }
 0x3cf   :  { %v3282_v17 = vpop.f32.mrb[77].mxu1 }
 0x3d0   :  { %v3283_v18 = vadd.f32 %v3282_v17, %v3281_v50  ;;  %v3284_v19 = vpop.f32.mrb[78].mxu1  ;;  %v1295_v20 = vpack.c.bf16 %v1274_v11, %v1273_v57 }
 0x3d1   :  { %v3285_v24 = vpop.f32.mrb[79].mxu1 }
 0x3d2   :  { %v1215_v25 = vadd.f32 %v3283_v18, %v4336_v26  ;;  %v3286_v27 = vadd.f32 %v3285_v24, %v3284_v19  ;;  %3698 = vmatprep.mubr.bf16.mxu0 %v1295_v20 }
 0x3d4   :  { %v1218_v28 = vadd.f32 %v3286_v27, %v4336_v26  ;;  %v1275_v29 = vmax.f32 %v1215_v25, 0.0 }
 0x3d6   :  { %v1276_v30 = vmax.f32 %v1218_v28, 0.0  ;;  %v3287_v31 = vpop.f32.mrb[80].mxu1 }
 0x3d7   :  { %v3288_v32 = vpop.f32.mrb[81].mxu1 }
 0x3d8   :  { %v3289_v33 = vadd.f32 %v3288_v32, %v3287_v31  ;;  %v3290_v34 = vpop.f32.mrb[82].mxu1  ;;  %v1296_v35 = vpack.c.bf16 %v1276_v30, %v1275_v29 }
 0x3d9   :  { %v3291_v36 = vpop.f32.mrb[83].mxu1 }
 0x3da   :  { %v1223_v37 = vadd.f32 %v3289_v33, %v4336_v26  ;;  %v3292_v38 = vadd.f32 %v3291_v36, %v3290_v34  ;;  %3699 = vmatmul.mubr.bf16.gmra.mrb[84].mxu0 %v1296_v35 }
 0x3dc   :  { %v1226_v39 = vadd.f32 %v3292_v38, %v4336_v26  ;;  %v1277_v40 = vmax.f32 %v1223_v37, 0.0 }
 0x3de   :  { %v1278_v41 = vmax.f32 %v1226_v39, 0.0  ;;  %v3293_v43 = vpop.f32.mrb[84].mxu1 }
 0x3df   :  { %v3294_v44 = vpop.f32.mrb[85].mxu1 }
 0x3e0   :  { %v3295_v47 = vadd.f32 %v3294_v44, %v3293_v43  ;;  %v3296_v48 = vpop.f32.mrb[86].mxu1  ;;  %v1297_v51 = vpack.c.bf16 %v1278_v41, %v1277_v40 }
 0x3e1   :  { %v3297_v52 = vpop.f32.mrb[87].mxu1 }
 0x3e2   :  { %v1231_v53 = vadd.f32 %v3295_v47, %v4336_v26  ;;  %v3298_v54 = vadd.f32 %v3297_v52, %v3296_v48  ;;  %3702 = vmatprep.mubr.bf16.mxu0 %v1297_v51 }
 0x3e4   :  { %v1234_v55 = vadd.f32 %v3298_v54, %v4336_v26  ;;  %v1279_v61 = vmax.f32 %v1231_v53, 0.0 }
 0x3e6   :  { %v1280_v63 = vmax.f32 %v1234_v55, 0.0  ;;  %v3299_v1 = vpop.f32.mrb[88].mxu1 }
 0x3e7   :  { %v3300_v2 = vpop.f32.mrb[89].mxu1 }
 0x3e8   :  { %v3301_v3 = vadd.f32 %v3300_v2, %v3299_v1  ;;  %v3302_v4 = vpop.f32.mrb[90].mxu1  ;;  %v1298_v5 = vpack.c.bf16 %v1280_v63, %v1279_v61 }
 0x3e9   :  { %v3303_v6 = vpop.f32.mrb[91].mxu1 }
 0x3ea   :  { %v1239_v7 = vadd.f32 %v3301_v3, %v4336_v26  ;;  %v3304_v8 = vadd.f32 %v3303_v6, %v3302_v4  ;;  %3703 = vmatmul.mubr.bf16.gmra.mrb[88].mxu0 %v1298_v5 }
 0x3ec   :  { %v1242_v9 = vadd.f32 %v3304_v8, %v4336_v26  ;;  %v1281_v10 = vmax.f32 %v1239_v7, 0.0 }
 0x3ee   :  { %v1282_v12 = vmax.f32 %v1242_v9, 0.0  ;;  %v3305_v13 = vpop.f32.mrb[92].mxu1  ;;  %v3917_v9 = vld [vmem:[#allocation8 + $0x80] sm:$0xff]  }
 0x3ef   :  { %v3306_v14 = vpop.f32.mrb[93].mxu1  ;;  %3710 = vmatprep.subr.bf16.mxu1 %v3917_v9 }
 0x3f0   :  { %v3307_v15 = vadd.f32 %v3306_v14, %v3305_v13  ;;  %v3308_v16 = vpop.f32.mrb[94].mxu1  ;;  %v1299_v21 = vpack.c.bf16 %v1282_v12, %v1281_v10  ;;  %v3918_v10 = vld [vmem:[#allocation8 + $0x88] sm:$0xff]   ;;  %3711 = vmatpush3.bf16.msra.mxu1 %v3917_v9  ;;  %v3919_v13 = vld [vmem:[#allocation8 + $0x90] sm:$0xff]  }
 0x3f1   :  { %v3309_v23 = vpop.f32.mrb[95].mxu1  ;;  %v4373_v12 = vld [vmem:[#allocation3] ss:$8 sps:$4 sm:$0xff]   ;;  %3712 = vmatprep.subr.bf16.mxu1 %v3918_v10  ;;  %v4375_v14 = vld [vmem:[#allocation3 + $0x14] ss:$8 sps:$4 sm:$0xff]  }
 0x3f2   :  { %v1247_v45 = vadd.f32 %v3307_v15, %v4336_v26  ;;  %v3310_v46 = vadd.f32 %v3309_v23, %v3308_v16  ;;  %3706 = vmatprep.mubr.bf16.mxu0 %v1299_v21  ;;  %v4379_v15 = vld [vmem:[#allocation3 + $0x10] ss:$8 sps:$4 sm:$0xff]   ;;  %v4381_v16 = vld [vmem:[#allocation3 + $0x24] ss:$8 sps:$4 sm:$0xff]   ;;  %v4385_v21 = vld [vmem:[#allocation3 + $0x20] ss:$8 sps:$4 sm:$0xff]  }
 0x3f3   :  { %v4387_v23 = vld [vmem:[#allocation3 + $0x34] ss:$8 sps:$4 sm:$0xff]  }
 0x3f4   :  { %v1250_v49 = vadd.f32 %v3310_v46, %v4336_v26  ;;  %v1283_v56 = vmax.f32 %v1247_v45, 0.0  ;;  %3713 = vmatpush3.bf16.msra.mxu1 %v3918_v10  ;;  %v4391_v45 = vld [vmem:[#allocation3 + $0x30] ss:$8 sps:$4 sm:$0xff]   ;;  %v4393_v46 = vld [vmem:[#allocation3 + $0x44] ss:$8 sps:$4 sm:$0xff]  }
 0x3f5   :  { %3714 = vmatprep.subr.bf16.mxu1 %v3919_v13 }
 0x3f6   :  { %v1284_v59 = vmax.f32 %v1250_v49, 0.0  ;;  %v4397_v49 = vld [vmem:[#allocation3 + $0x40] ss:$8 sps:$4 sm:$0xff]  }
 0x3f8   :  { %v1300_v22 = vpack.c.bf16 %v1284_v59, %v1283_v56  ;;  %3715 = vmatpush3.bf16.msra.mxu1 %v3919_v13  ;;  %v4399_v56 = vld [vmem:[#allocation3 + $0x54] ss:$8 sps:$4 sm:$0xff]   ;;  %v4403_v59 = vld [vmem:[#allocation3 + $0x50] ss:$8 sps:$4 sm:$0xff]  }
 0x3fa   :  { %3707 = vmatmul.mubr.bf16.gmra.mrb[92].mxu0 %v1300_v22  ;;  %v4405_v22 = vld [vmem:[#allocation3 + $0x64] ss:$8 sps:$4 sm:$0xff]  }
 0x3fb   :  { %1807 = vmatprep.mubr.bf16.mxu0 %v4370_v42 }
 0x45d   :  { %v3680_v58 = vpop.f32.mrb[64].mxu0 }
 0x45e   :  { %v1432_v60 = vpop.f32.mrb[65].mxu0 }
 0x45f   :  { %v3681_v62 = vpop.f32.mrb[66].mxu0 }
 0x460   :  { %v1560_v0 = vpack.c.bf16 %v3681_v62, %v3680_v58  ;;  %v1435_v57 = vpop.f32.mrb[67].mxu0  ;;  %v4409_v58 = vld [vmem:[#allocation3 + $0x60] ss:$8 sps:$4 sm:$0xff]   ;;  %v4415_v62 = vld [vmem:[#allocation3 + $0x70] ss:$8 sps:$4 sm:$0xff]  }
 0x461   :  { %v1559_v11 = vpack.c.bf16 %v1435_v57, %v1432_v60  ;;  %v4411_v60 = vld [vmem:[#allocation3 + $0x74] ss:$8 sps:$4 sm:$0xff]   ;;  %v4421_v57 = vld [vmem:[#allocation3 + $0x80] ss:$8 sps:$4 sm:$0xff]  }
 0x46d   :  { %v3684_v50 = vpop.f32.mrb[68].mxu0 }
 0x46e   :  { %v1448_v17 = vpop.f32.mrb[69].mxu0 }
 0x46f   :  { %v3685_v18 = vpop.f32.mrb[70].mxu0 }
 0x470   :  { %v1562_v19 = vpack.c.bf16 %v3685_v18, %v3684_v50  ;;  %v1451_v20 = vpop.f32.mrb[71].mxu0  ;;  %v4427_v50 = vld [vmem:[#allocation3 + $0x90] ss:$8 sps:$4 sm:$0xff]   ;;  %v4433_v18 = vld [vmem:[#allocation3 + $0xa0] ss:$8 sps:$4 sm:$0xff]  }
 0x471   :  { %v1561_v26 = vpack.c.bf16 %v1451_v20, %v1448_v17  ;;  %v4429_v17 = vld [vmem:[#allocation3 + $0xa4] ss:$8 sps:$4 sm:$0xff]   ;;  %v3920_v20 = vld [vmem:[#allocation8 + $0x98] sm:$0xff]  }
 0x472   :  { %3716 = vmatprep.subr.bf16.mxu1 %v3920_v20 }
 0x473   :  { %3717 = vmatpush3.bf16.msra.mxu1 %v3920_v20 }
 0x47d   :  { %v3688_v24 = vpop.f32.mrb[72].mxu0 }
 0x47e   :  { %v1464_v25 = vpop.f32.mrb[73].mxu0 }
 0x47f   :  { %v3689_v27 = vpop.f32.mrb[74].mxu0 }
 0x480   :  { %v1564_v28 = vpack.c.bf16 %v3689_v27, %v3688_v24  ;;  %v1467_v29 = vpop.f32.mrb[75].mxu0  ;;  %v4441_v24 = vld [vmem:[#allocation3 + $0xc4] ss:$8 sps:$4 sm:$0xff]  }
 0x481   :  { %v1563_v30 = vpack.c.bf16 %v1467_v29, %v1464_v25  ;;  %v3921_v25 = vld [vmem:[#allocation8 + $0xa0] sm:$0xff]   ;;  %v3922_v27 = vld [vmem:[#allocation8 + $0xa8] sm:$0xff]   ;;  %v4447_v29 = vld [vmem:[#allocation3 + $0xd4] ss:$8 sps:$4 sm:$0xff]  }
 0x482   :  { %3718 = vmatprep.subr.bf16.mxu1 %v3921_v25 }
 0x483   :  { %3719 = vmatpush3.bf16.msra.mxu1 %v3921_v25 }
 0x484   :  { %3720 = vmatprep.subr.bf16.mxu1 %v3922_v27 }
 0x487   :  { %3721 = vmatpush3.bf16.msra.mxu1 %v3922_v27 }
 0x48d   :  { %v3692_v31 = vpop.f32.mrb[76].mxu0 }
 0x48e   :  { %v1480_v32 = vpop.f32.mrb[77].mxu0 }
 0x48f   :  { %v3693_v33 = vpop.f32.mrb[78].mxu0 }
 0x490   :  { %v1566_v34 = vpack.c.bf16 %v3693_v33, %v3692_v31  ;;  %v1483_v35 = vpop.f32.mrb[79].mxu0  ;;  %v3924_v31 = vld [vmem:[#allocation8 + $0xb8] sm:$0xff]   ;;  %v4453_v33 = vld [vmem:[#allocation3 + $0xe4] ss:$8 sps:$4 sm:$0xff]  }
 0x491   :  { %v1565_v36 = vpack.c.bf16 %v1483_v35, %v1480_v32  ;;  %v4451_v32 = vld [vmem:[#allocation3 + $0xd0] ss:$8 sps:$4 sm:$0xff]   ;;  %v4459_v35 = vld [vmem:[#allocation3 + $0xf4] ss:$8 sps:$4 sm:$0xff]  }
 0x49d   :  { %v3696_v37 = vpop.f32.mrb[80].mxu0 }
 0x49e   :  { %v1496_v38 = vpop.f32.mrb[81].mxu0 }
 0x49f   :  { %v3697_v39 = vpop.f32.mrb[82].mxu0 }
 0x4a0   :  { %v1568_v40 = vpack.c.bf16 %v3697_v39, %v3696_v37  ;;  %v1499_v41 = vpop.f32.mrb[83].mxu0 }
 0x4a1   :  { %v1567_v43 = vpack.c.bf16 %v1499_v41, %v1496_v38  ;;  %v4469_v38 = vld [vmem:[%s4623_s3 + $0x2] ss:$0 sm:$0xff] }
 0x4a3   :  { %3335 = vmatprep.subr.bf16.mxu0 %v1567_v43 }
 0x4a4   :  { %3336 = vmatpush3.bf16.msra.mxu0 %v1559_v11  ;;  %v4423_v11 = vld [vmem:[#allocation3 + $0x94] ss:$8 sps:$4 sm:$0xff]  }
 0x4a5   :  { %3337 = vmatprep.subr.bf16.mxu0 %v1568_v40 }
 0x4a8   :  { %3338 = vmatpush3.bf16.msra.mxu0 %v1560_v0  ;;  %v4417_v0 = vld [vmem:[#allocation3 + $0x84] ss:$8 sps:$4 sm:$0xff]  }
 0x4ad   :  { %v3700_v44 = vpop.f32.mrb[84].mxu0 }
 0x4ae   :  { %v1512_v47 = vpop.f32.mrb[85].mxu0 }
 0x4af   :  { %v3701_v48 = vpop.f32.mrb[86].mxu0 }
 0x4b0   :  { %v1570_v51 = vpack.c.bf16 %v3701_v48, %v3700_v44  ;;  %v1515_v52 = vpop.f32.mrb[87].mxu0 }
 0x4b1   :  { %v1569_v53 = vpack.c.bf16 %v1515_v52, %v1512_v47 }
 0x4b3   :  { %3339 = vmatprep.subr.bf16.mxu0 %v1569_v53 }
 0x4b4   :  { %3340 = vmatpush3.bf16.msra.mxu0 %v1561_v26  ;;  %v4439_v26 = vld [vmem:[#allocation3 + $0xb0] ss:$8 sps:$4 sm:$0xff]  }
 0x4b5   :  { %3341 = vmatprep.subr.bf16.mxu0 %v1570_v51 }
 0x4b8   :  { %3342 = vmatpush3.bf16.msra.mxu0 %v1562_v19  ;;  %v4435_v19 = vld [vmem:[#allocation3 + $0xb4] ss:$8 sps:$4 sm:$0xff]  }
 0x4bd   :  { %v3704_v54 = vpop.f32.mrb[88].mxu0 }
 0x4be   :  { %v1528_v55 = vpop.f32.mrb[89].mxu0 }
 0x4bf   :  { %v3705_v61 = vpop.f32.mrb[90].mxu0 }
 0x4c0   :  { %v1572_v63 = vpack.c.bf16 %v3705_v61, %v3704_v54  ;;  %v1531_v1 = vpop.f32.mrb[91].mxu0 }
 0x4c1   :  { %v1571_v2 = vpack.c.bf16 %v1531_v1, %v1528_v55 }
 0x4c3   :  { %3343 = vmatprep.subr.bf16.mxu0 %v1571_v2 }
 0x4c4   :  { %3344 = vmatpush3.bf16.msra.mxu0 %v1563_v30  ;;  %v3923_v30 = vld [vmem:[#allocation8 + $0xb0] sm:$0xff]  }
 0x4c5   :  { %3345 = vmatprep.subr.bf16.mxu0 %v1572_v63  ;;  %3722 = vmatprep.subr.bf16.mxu1 %v3923_v30 }
 0x4c6   :  { %3723 = vmatpush3.bf16.msra.mxu1 %v3923_v30 }
 0x4c7   :  { %3724 = vmatprep.subr.bf16.mxu1 %v3924_v31 }
 0x4c8   :  { %3346 = vmatpush3.bf16.msra.mxu0 %v1564_v28  ;;  %v4445_v28 = vld [vmem:[#allocation3 + $0xc0] ss:$8 sps:$4 sm:$0xff]  }
 0x4ca   :  { %3725 = vmatpush3.bf16.msra.mxu1 %v3924_v31 }
 0x4cd   :  { %v3708_v3 = vpop.f32.mrb[92].mxu0 }
 0x4ce   :  { %v1544_v4 = vpop.f32.mrb[93].mxu0 }
 0x4cf   :  { %v3709_v5 = vpop.f32.mrb[94].mxu0 }
 0x4d0   :  { %v1574_v6 = vpack.c.bf16 %v3709_v5, %v3708_v3  ;;  %v1547_v7 = vpop.f32.mrb[95].mxu0 }
 0x4d1   :  { %v1573_v8 = vpack.c.bf16 %v1547_v7, %v1544_v4 }
 0x4d3   :  { %3347 = vmatprep.subr.bf16.mxu0 %v1573_v8 }
 0x4d4   :  { %3348 = vmatpush3.bf16.msra.mxu0 %v1565_v36  ;;  %v4463_v36 = vld [vmem:[#allocation3 + $0xf0] ss:$8 sps:$4 sm:$0xff]  }
 0x4d5   :  { %3349 = vmatprep.subr.bf16.mxu0 %v1574_v6 }
 0x4d8   :  { %3350 = vmatpush3.bf16.msra.mxu0 %v1566_v34  ;;  %v4457_v34 = vld [vmem:[#allocation3 + $0xe0] ss:$8 sps:$4 sm:$0xff]  }
 0x4db   :  { %1808 = vmatmul.mubr.bf16.vlgmr.msra.gmra.mrb[96].mxu0 %v4373_v12 }
 0x4dc   :  { %1815 = vmatprep.mubr.bf16.mxu0 %v4375_v14 }
 0x4e3   :  { %1816 = vmatmul.mubr.bf16.gmra.mrb[100].mxu0 %v4379_v15 }
 0x4e4   :  { %1823 = vmatprep.mubr.bf16.mxu0 %v4381_v16 }
 0x4eb   :  { %1824 = vmatmul.mubr.bf16.gmra.mrb[104].mxu0 %v4385_v21 }
 0x4ec   :  { %1831 = vmatprep.mubr.bf16.mxu0 %v4387_v23 }
 0x4f3   :  { %1832 = vmatmul.mubr.bf16.gmra.mrb[108].mxu0 %v4391_v45 }
 0x4f4   :  { %1839 = vmatprep.mubr.bf16.mxu0 %v4393_v46 }
 0x4fb   :  { %1840 = vmatmul.mubr.bf16.gmra.mrb[112].mxu0 %v4397_v49 }
 0x4fc   :  { %1847 = vmatprep.mubr.bf16.mxu0 %v4399_v56 }
 0x503   :  { %1848 = vmatmul.mubr.bf16.gmra.mrb[116].mxu0 %v4403_v59 }
 0x504   :  { %1855 = vmatprep.mubr.bf16.mxu0 %v4405_v22 }
 0x50b   :  { %1856 = vmatmul.mubr.bf16.gmra.mrb[120].mxu0 %v4409_v58 }
 0x50c   :  { %1863 = vmatprep.mubr.bf16.mxu0 %v4411_v60 }
 0x513   :  { %1864 = vmatmul.mubr.bf16.gmra.mrb[124].mxu0 %v4415_v62 }
 0x514   :  { %1871 = vmatprep.mubr.bf16.mxu0 %v4417_v0 }
 0x51b   :  { %1872 = vmatmul.mubr.bf16.gmra.mrb[128].mxu0 %v4421_v57 }
 0x51c   :  { %1879 = vmatprep.mubr.bf16.mxu0 %v4423_v11 }
 0x523   :  { %1880 = vmatmul.mubr.bf16.gmra.mrb[132].mxu0 %v4427_v50 }
 0x524   :  { %1887 = vmatprep.mubr.bf16.mxu0 %v4429_v17 }
 0x52b   :  { %1888 = vmatmul.mubr.bf16.gmra.mrb[136].mxu0 %v4433_v18 }
 0x52c   :  { %1895 = vmatprep.mubr.bf16.mxu0 %v4435_v19 }
 0x533   :  { %1896 = vmatmul.mubr.bf16.gmra.mrb[140].mxu0 %v4439_v26 }
 0x534   :  { %1903 = vmatprep.mubr.bf16.mxu0 %v4441_v24 }
 0x53b   :  { %1904 = vmatmul.mubr.bf16.gmra.mrb[144].mxu0 %v4445_v28 }
 0x53c   :  { %1911 = vmatprep.mubr.bf16.mxu0 %v4447_v29 }
 0x543   :  { %1912 = vmatmul.mubr.bf16.gmra.mrb[148].mxu0 %v4451_v32 }
 0x544   :  { %1919 = vmatprep.mubr.bf16.mxu0 %v4453_v33 }
 0x54b   :  { %1920 = vmatmul.mubr.bf16.gmra.mrb[152].mxu0 %v4457_v34 }
 0x54c   :  { %1927 = vmatprep.mubr.bf16.mxu0 %v4459_v35 }
 0x553   :  { %1928 = vmatmul.mubr.bf16.gmra.mrb[156].mxu0 %v4463_v36 }
 0x5ae   :  { %v3351_v37 = vpop.f32.mrb[96].mxu0 }
 0x5af   :  { %v3352_v39 = vpop.f32.mrb[97].mxu0 }
 0x5b0   :  { %v3353_v40 = vadd.f32 %v3352_v39, %v3351_v37  ;;  %v3354_v41 = vpop.f32.mrb[98].mxu0 }
 0x5b1   :  { %v3355_v43 = vpop.f32.mrb[99].mxu0 }
 0x5b2   :  { %v1810_v44 = vadd.f32 %v3353_v40, %v4469_v38  ;;  %v3356_v47 = vadd.f32 %v3355_v43, %v3354_v41 }
 0x5b4   :  { %v1813_v48 = vadd.f32 %v3356_v47, %v4469_v38  ;;  %v1936_v51 = vmax.f32 %v1810_v44, 0.0 }
 0x5b6   :  { %v1937_v52 = vmax.f32 %v1813_v48, 0.0  ;;  %v3357_v53 = vpop.f32.mrb[100].mxu0 }
 0x5b7   :  { %v3358_v54 = vpop.f32.mrb[101].mxu0 }
 0x5b8   :  { %v3359_v55 = vadd.f32 %v3358_v54, %v3357_v53  ;;  %v3360_v61 = vpop.f32.mrb[102].mxu0  ;;  %v1968_v63 = vpack.c.bf16 %v1937_v52, %v1936_v51 }
 0x5b9   :  { %v3361_v1 = vpop.f32.mrb[103].mxu0 }
 0x5ba   :  { %v1818_v2 = vadd.f32 %v3359_v55, %v4469_v38  ;;  %v3362_v3 = vadd.f32 %v3361_v1, %v3360_v61  ;;  %3726 = vmatprep.mubr.bf16.mxu1 %v1968_v63 }
 0x5bc   :  { %v1821_v4 = vadd.f32 %v3362_v3, %v4469_v38  ;;  %v1938_v5 = vmax.f32 %v1818_v2, 0.0 }
 0x5be   :  { %v1939_v6 = vmax.f32 %v1821_v4, 0.0  ;;  %v3363_v7 = vpop.f32.mrb[104].mxu0 }
 0x5bf   :  { %v3364_v8 = vpop.f32.mrb[105].mxu0 }
 0x5c0   :  { %v1969_v9 = vpack.c.bf16 %v1939_v6, %v1938_v5  ;;  %v3365_v10 = vadd.f32 %v3364_v8, %v3363_v7  ;;  %v3366_v13 = vpop.f32.mrb[106].mxu0 }
 0x5c1   :  { %v3367_v20 = vpop.f32.mrb[107].mxu0 }
 0x5c2   :  { %v1826_v25 = vadd.f32 %v3365_v10, %v4469_v38  ;;  %v3368_v27 = vadd.f32 %v3367_v20, %v3366_v13  ;;  %3727 = vmatmul.mubr.bf16.vlgmr.msra.gmra.mrb[96].mxu1 %v1969_v9 }
 0x5c4   :  { %v1829_v30 = vadd.f32 %v3368_v27, %v4469_v38  ;;  %v1940_v31 = vmax.f32 %v1826_v25, 0.0 }
 0x5c6   :  { %v1941_v37 = vmax.f32 %v1829_v30, 0.0  ;;  %v3369_v39 = vpop.f32.mrb[108].mxu0 }
 0x5c7   :  { %v3370_v40 = vpop.f32.mrb[109].mxu0 }
 0x5c8   :  { %v3371_v41 = vadd.f32 %v3370_v40, %v3369_v39  ;;  %v3372_v43 = vpop.f32.mrb[110].mxu0  ;;  %v1970_v44 = vpack.c.bf16 %v1941_v37, %v1940_v31 }
 0x5c9   :  { %v3373_v47 = vpop.f32.mrb[111].mxu0 }
 0x5ca   :  { %v1834_v48 = vadd.f32 %v3371_v41, %v4469_v38  ;;  %v3374_v51 = vadd.f32 %v3373_v47, %v3372_v43  ;;  %3730 = vmatprep.mubr.bf16.mxu1 %v1970_v44 }
 0x5cc   :  { %v1837_v52 = vadd.f32 %v3374_v51, %v4469_v38  ;;  %v1942_v53 = vmax.f32 %v1834_v48, 0.0 }
 0x5ce   :  { %v1943_v54 = vmax.f32 %v1837_v52, 0.0  ;;  %v3375_v55 = vpop.f32.mrb[112].mxu0 }
 0x5cf   :  { %v3376_v61 = vpop.f32.mrb[113].mxu0 }
 0x5d0   :  { %v3377_v63 = vadd.f32 %v3376_v61, %v3375_v55  ;;  %v3378_v1 = vpop.f32.mrb[114].mxu0  ;;  %v1971_v2 = vpack.c.bf16 %v1943_v54, %v1942_v53 }
 0x5d1   :  { %v3379_v3 = vpop.f32.mrb[115].mxu0 }
 0x5d2   :  { %v1842_v4 = vadd.f32 %v3377_v63, %v4469_v38  ;;  %v3380_v5 = vadd.f32 %v3379_v3, %v3378_v1  ;;  %3731 = vmatmul.mubr.bf16.gmra.mrb[100].mxu1 %v1971_v2 }
 0x5d4   :  { %v1845_v6 = vadd.f32 %v3380_v5, %v4469_v38  ;;  %v1944_v7 = vmax.f32 %v1842_v4, 0.0 }
 0x5d6   :  { %v1945_v8 = vmax.f32 %v1845_v6, 0.0  ;;  %v3381_v9 = vpop.f32.mrb[116].mxu0 }
 0x5d7   :  { %v3382_v10 = vpop.f32.mrb[117].mxu0 }
 0x5d8   :  { %v3383_v13 = vadd.f32 %v3382_v10, %v3381_v9  ;;  %v3384_v20 = vpop.f32.mrb[118].mxu0  ;;  %v1972_v25 = vpack.c.bf16 %v1945_v8, %v1944_v7 }
 0x5d9   :  { %v3385_v27 = vpop.f32.mrb[119].mxu0 }
 0x5da   :  { %v1850_v30 = vadd.f32 %v3383_v13, %v4469_v38  ;;  %v3386_v31 = vadd.f32 %v3385_v27, %v3384_v20  ;;  %3734 = vmatprep.mubr.bf16.mxu1 %v1972_v25 }
 0x5dc   :  { %v1853_v37 = vadd.f32 %v3386_v31, %v4469_v38  ;;  %v1946_v39 = vmax.f32 %v1850_v30, 0.0 }
 0x5de   :  { %v1947_v40 = vmax.f32 %v1853_v37, 0.0  ;;  %v3387_v41 = vpop.f32.mrb[120].mxu0 }
 0x5df   :  { %v3388_v43 = vpop.f32.mrb[121].mxu0 }
 0x5e0   :  { %v3389_v44 = vadd.f32 %v3388_v43, %v3387_v41  ;;  %v3390_v47 = vpop.f32.mrb[122].mxu0  ;;  %v1973_v48 = vpack.c.bf16 %v1947_v40, %v1946_v39 }
 0x5e1   :  { %v3391_v51 = vpop.f32.mrb[123].mxu0 }
 0x5e2   :  { %v1858_v52 = vadd.f32 %v3389_v44, %v4469_v38  ;;  %v3392_v53 = vadd.f32 %v3391_v51, %v3390_v47  ;;  %3735 = vmatmul.mubr.bf16.gmra.mrb[104].mxu1 %v1973_v48 }
 0x5e4   :  { %v1861_v54 = vadd.f32 %v3392_v53, %v4469_v38  ;;  %v1948_v55 = vmax.f32 %v1858_v52, 0.0 }
 0x5e6   :  { %v1949_v61 = vmax.f32 %v1861_v54, 0.0  ;;  %v3393_v63 = vpop.f32.mrb[124].mxu0 }
 0x5e7   :  { %v3394_v1 = vpop.f32.mrb[125].mxu0 }
 0x5e8   :  { %v3395_v2 = vadd.f32 %v3394_v1, %v3393_v63  ;;  %v3396_v3 = vpop.f32.mrb[126].mxu0  ;;  %v1974_v4 = vpack.c.bf16 %v1949_v61, %v1948_v55 }
 0x5e9   :  { %v3397_v5 = vpop.f32.mrb[127].mxu0 }
 0x5ea   :  { %v1866_v6 = vadd.f32 %v3395_v2, %v4469_v38  ;;  %v3398_v7 = vadd.f32 %v3397_v5, %v3396_v3  ;;  %3738 = vmatprep.mubr.bf16.mxu1 %v1974_v4 }
 0x5ec   :  { %v1869_v8 = vadd.f32 %v3398_v7, %v4469_v38  ;;  %v1950_v9 = vmax.f32 %v1866_v6, 0.0 }
 0x5ee   :  { %v1951_v10 = vmax.f32 %v1869_v8, 0.0  ;;  %v3399_v13 = vpop.f32.mrb[128].mxu0 }
 0x5ef   :  { %v3400_v20 = vpop.f32.mrb[129].mxu0 }
 0x5f0   :  { %v3401_v25 = vadd.f32 %v3400_v20, %v3399_v13  ;;  %v3402_v27 = vpop.f32.mrb[130].mxu0  ;;  %v1975_v30 = vpack.c.bf16 %v1951_v10, %v1950_v9 }
 0x5f1   :  { %v3403_v31 = vpop.f32.mrb[131].mxu0 }
 0x5f2   :  { %v1874_v37 = vadd.f32 %v3401_v25, %v4469_v38  ;;  %v3404_v39 = vadd.f32 %v3403_v31, %v3402_v27  ;;  %3739 = vmatmul.mubr.bf16.gmra.mrb[108].mxu1 %v1975_v30 }
 0x5f4   :  { %v1877_v40 = vadd.f32 %v3404_v39, %v4469_v38  ;;  %v1952_v41 = vmax.f32 %v1874_v37, 0.0 }
 0x5f6   :  { %v1953_v43 = vmax.f32 %v1877_v40, 0.0  ;;  %v3405_v44 = vpop.f32.mrb[132].mxu0 }
 0x5f7   :  { %v3406_v47 = vpop.f32.mrb[133].mxu0 }
 0x5f8   :  { %v3407_v48 = vadd.f32 %v3406_v47, %v3405_v44  ;;  %v3408_v51 = vpop.f32.mrb[134].mxu0  ;;  %v1976_v52 = vpack.c.bf16 %v1953_v43, %v1952_v41 }
 0x5f9   :  { %v3409_v53 = vpop.f32.mrb[135].mxu0 }
 0x5fa   :  { %v1882_v54 = vadd.f32 %v3407_v48, %v4469_v38  ;;  %v3410_v55 = vadd.f32 %v3409_v53, %v3408_v51  ;;  %3742 = vmatprep.mubr.bf16.mxu1 %v1976_v52 }
 0x5fc   :  { %v1885_v61 = vadd.f32 %v3410_v55, %v4469_v38  ;;  %v1954_v63 = vmax.f32 %v1882_v54, 0.0 }
 0x5fe   :  { %v1955_v1 = vmax.f32 %v1885_v61, 0.0  ;;  %v3411_v2 = vpop.f32.mrb[136].mxu0 }
 0x5ff   :  { %v3412_v3 = vpop.f32.mrb[137].mxu0 }
 0x600   :  { %v3413_v4 = vadd.f32 %v3412_v3, %v3411_v2  ;;  %v3414_v5 = vpop.f32.mrb[138].mxu0  ;;  %v1977_v6 = vpack.c.bf16 %v1955_v1, %v1954_v63 }
 0x601   :  { %v3415_v7 = vpop.f32.mrb[139].mxu0 }
 0x602   :  { %v1890_v8 = vadd.f32 %v3413_v4, %v4469_v38  ;;  %v3416_v9 = vadd.f32 %v3415_v7, %v3414_v5  ;;  %3743 = vmatmul.mubr.bf16.gmra.mrb[112].mxu1 %v1977_v6 }
 0x604   :  { %v1893_v10 = vadd.f32 %v3416_v9, %v4469_v38  ;;  %v1956_v13 = vmax.f32 %v1890_v8, 0.0 }
 0x606   :  { %v1957_v20 = vmax.f32 %v1893_v10, 0.0  ;;  %v3417_v25 = vpop.f32.mrb[140].mxu0 }
 0x607   :  { %v3418_v27 = vpop.f32.mrb[141].mxu0 }
 0x608   :  { %v3419_v30 = vadd.f32 %v3418_v27, %v3417_v25  ;;  %v3420_v31 = vpop.f32.mrb[142].mxu0  ;;  %v1978_v37 = vpack.c.bf16 %v1957_v20, %v1956_v13 }
 0x609   :  { %v3421_v39 = vpop.f32.mrb[143].mxu0 }
 0x60a   :  { %v1898_v40 = vadd.f32 %v3419_v30, %v4469_v38  ;;  %v3422_v41 = vadd.f32 %v3421_v39, %v3420_v31  ;;  %3746 = vmatprep.mubr.bf16.mxu1 %v1978_v37 }
 0x60c   :  { %v1901_v43 = vadd.f32 %v3422_v41, %v4469_v38  ;;  %v1958_v44 = vmax.f32 %v1898_v40, 0.0 }
 0x60e   :  { %v1959_v47 = vmax.f32 %v1901_v43, 0.0  ;;  %v3423_v48 = vpop.f32.mrb[144].mxu0 }
 0x60f   :  { %v3424_v51 = vpop.f32.mrb[145].mxu0 }
 0x610   :  { %v3425_v52 = vadd.f32 %v3424_v51, %v3423_v48  ;;  %v3426_v53 = vpop.f32.mrb[146].mxu0  ;;  %v1979_v54 = vpack.c.bf16 %v1959_v47, %v1958_v44 }
 0x611   :  { %v3427_v55 = vpop.f32.mrb[147].mxu0 }
 0x612   :  { %v1906_v61 = vadd.f32 %v3425_v52, %v4469_v38  ;;  %v3428_v63 = vadd.f32 %v3427_v55, %v3426_v53  ;;  %3747 = vmatmul.mubr.bf16.gmra.mrb[116].mxu1 %v1979_v54 }
 0x614   :  { %v1909_v1 = vadd.f32 %v3428_v63, %v4469_v38  ;;  %v1960_v2 = vmax.f32 %v1906_v61, 0.0 }
 0x616   :  { %v1961_v3 = vmax.f32 %v1909_v1, 0.0  ;;  %v3429_v4 = vpop.f32.mrb[148].mxu0 }
 0x617   :  { %v3430_v5 = vpop.f32.mrb[149].mxu0 }
 0x618   :  { %v3431_v6 = vadd.f32 %v3430_v5, %v3429_v4  ;;  %v3432_v7 = vpop.f32.mrb[150].mxu0  ;;  %v1980_v8 = vpack.c.bf16 %v1961_v3, %v1960_v2 }
 0x619   :  { %v3433_v9 = vpop.f32.mrb[151].mxu0 }
 0x61a   :  { %v1914_v10 = vadd.f32 %v3431_v6, %v4469_v38  ;;  %v3434_v13 = vadd.f32 %v3433_v9, %v3432_v7  ;;  %3750 = vmatprep.mubr.bf16.mxu1 %v1980_v8 }
 0x61c   :  { %v1917_v20 = vadd.f32 %v3434_v13, %v4469_v38  ;;  %v1962_v25 = vmax.f32 %v1914_v10, 0.0 }
 0x61e   :  { %v1963_v27 = vmax.f32 %v1917_v20, 0.0  ;;  %v3435_v30 = vpop.f32.mrb[152].mxu0 }
 0x61f   :  { %v3436_v31 = vpop.f32.mrb[153].mxu0 }
 0x620   :  { %v3437_v37 = vadd.f32 %v3436_v31, %v3435_v30  ;;  %v3438_v39 = vpop.f32.mrb[154].mxu0  ;;  %v1981_v40 = vpack.c.bf16 %v1963_v27, %v1962_v25 }
 0x621   :  { %v3439_v41 = vpop.f32.mrb[155].mxu0 }
 0x622   :  { %v1922_v43 = vadd.f32 %v3437_v37, %v4469_v38  ;;  %v3440_v44 = vadd.f32 %v3439_v41, %v3438_v39  ;;  %3751 = vmatmul.mubr.bf16.gmra.mrb[120].mxu1 %v1981_v40 }
 0x624   :  { %v1925_v47 = vadd.f32 %v3440_v44, %v4469_v38  ;;  %v1964_v48 = vmax.f32 %v1922_v43, 0.0 }
 0x626   :  { %v1965_v51 = vmax.f32 %v1925_v47, 0.0  ;;  %v3441_v52 = vpop.f32.mrb[156].mxu0 }
 0x627   :  { %v3442_v53 = vpop.f32.mrb[157].mxu0 }
 0x628   :  { %v3443_v54 = vadd.f32 %v3442_v53, %v3441_v52  ;;  %v3444_v55 = vpop.f32.mrb[158].mxu0  ;;  %v1982_v61 = vpack.c.bf16 %v1965_v51, %v1964_v48 }
 0x629   :  { %v3445_v63 = vpop.f32.mrb[159].mxu0 }
 0x62a   :  { %v1930_v1 = vadd.f32 %v3443_v54, %v4469_v38  ;;  %v3446_v2 = vadd.f32 %v3445_v63, %v3444_v55  ;;  %3754 = vmatprep.mubr.bf16.mxu1 %v1982_v61 }
 0x62c   :  { %v1933_v3 = vadd.f32 %v3446_v2, %v4469_v38  ;;  %v1966_v4 = vmax.f32 %v1930_v1, 0.0 }
 0x62e   :  { %v1967_v5 = vmax.f32 %v1933_v3, 0.0 }
 0x630   :  { %v1983_v6 = vpack.c.bf16 %v1967_v5, %v1966_v4 }
 0x632   :  { %3755 = vmatmul.mubr.bf16.gmra.mrb[124].mxu1 %v1983_v6 }
 0x633   :  { %2490 = vmatprep.mubr.bf16.mxu1 %v4370_v42 }
 0x695   :  { %v3728_v7 = vpop.f32.mrb[96].mxu1 }
 0x696   :  { %v2115_v8 = vpop.f32.mrb[97].mxu1 }
 0x697   :  { %v3729_v9 = vpop.f32.mrb[98].mxu1 }
 0x698   :  { %v2243_v10 = vpack.c.bf16 %v3729_v9, %v3728_v7  ;;  %v2118_v13 = vpop.f32.mrb[99].mxu1 }
 0x699   :  { %v2242_v20 = vpack.c.bf16 %v2118_v13, %v2115_v8 }
 0x6a5   :  { %v3732_v25 = vpop.f32.mrb[100].mxu1 }
 0x6a6   :  { %v2131_v27 = vpop.f32.mrb[101].mxu1 }
 0x6a7   :  { %v3733_v30 = vpop.f32.mrb[102].mxu1 }
 0x6a8   :  { %v2245_v31 = vpack.c.bf16 %v3733_v30, %v3732_v25  ;;  %v2134_v37 = vpop.f32.mrb[103].mxu1 }
 0x6a9   :  { %v2244_v39 = vpack.c.bf16 %v2134_v37, %v2131_v27 }
 0x6b5   :  { %v3736_v40 = vpop.f32.mrb[104].mxu1 }
 0x6b6   :  { %v2147_v38 = vpop.f32.mrb[105].mxu1 }
 0x6b7   :  { %v3737_v41 = vpop.f32.mrb[106].mxu1 }
 0x6b8   :  { %v2247_v43 = vpack.c.bf16 %v3737_v41, %v3736_v40  ;;  %v2150_v44 = vpop.f32.mrb[107].mxu1 }
 0x6b9   :  { %v2246_v47 = vpack.c.bf16 %v2150_v44, %v2147_v38 }
 0x6c5   :  { %v3740_v48 = vpop.f32.mrb[108].mxu1 }
 0x6c6   :  { %v2163_v42 = vpop.f32.mrb[109].mxu1 }
 0x6c7   :  { %v3741_v51 = vpop.f32.mrb[110].mxu1 }
 0x6c8   :  { %v2249_v52 = vpack.c.bf16 %v3741_v51, %v3740_v48  ;;  %v2166_v53 = vpop.f32.mrb[111].mxu1 }
 0x6c9   :  { %v2248_v54 = vpack.c.bf16 %v2166_v53, %v2163_v42 }
 0x6d5   :  { %v3744_v55 = vpop.f32.mrb[112].mxu1 }
 0x6d6   :  { %v2179_v61 = vpop.f32.mrb[113].mxu1 }
 0x6d7   :  { %v3745_v63 = vpop.f32.mrb[114].mxu1 }
 0x6d8   :  { %v2251_v1 = vpack.c.bf16 %v3745_v63, %v3744_v55  ;;  %v2182_v2 = vpop.f32.mrb[115].mxu1 }
 0x6d9   :  { %v2250_v3 = vpack.c.bf16 %v2182_v2, %v2179_v61 }
 0x6db   :  { %3471 = vmatprep.subr.bf16.mxu1 %v2250_v3 }
 0x6dc   :  { %3472 = vmatpush3.bf16.msra.mxu1 %v2242_v20 }
 0x6dd   :  { %3473 = vmatprep.subr.bf16.mxu1 %v2251_v1 }
 0x6e0   :  { %3474 = vmatpush3.bf16.msra.mxu1 %v2243_v10 }
 0x6e5   :  { %v3748_v4 = vpop.f32.mrb[116].mxu1 }
 0x6e6   :  { %v2195_v5 = vpop.f32.mrb[117].mxu1 }
 0x6e7   :  { %v3749_v6 = vpop.f32.mrb[118].mxu1 }
 0x6e8   :  { %v2253_v7 = vpack.c.bf16 %v3749_v6, %v3748_v4  ;;  %v2198_v8 = vpop.f32.mrb[119].mxu1 }
 0x6e9   :  { %v2252_v9 = vpack.c.bf16 %v2198_v8, %v2195_v5 }
 0x6eb   :  { %3475 = vmatprep.subr.bf16.mxu1 %v2252_v9 }
 0x6ec   :  { %3476 = vmatpush3.bf16.msra.mxu1 %v2244_v39 }
 0x6ed   :  { %3477 = vmatprep.subr.bf16.mxu1 %v2253_v7 }
 0x6f0   :  { %3478 = vmatpush3.bf16.msra.mxu1 %v2245_v31 }
 0x6f5   :  { %v3752_v13 = vpop.f32.mrb[120].mxu1 }
 0x6f6   :  { %v2211_v25 = vpop.f32.mrb[121].mxu1 }
 0x6f7   :  { %v3753_v27 = vpop.f32.mrb[122].mxu1 }
 0x6f8   :  { %v2255_v30 = vpack.c.bf16 %v3753_v27, %v3752_v13  ;;  %v2214_v37 = vpop.f32.mrb[123].mxu1 }
 0x6f9   :  { %v2254_v40 = vpack.c.bf16 %v2214_v37, %v2211_v25 }
 0x6fb   :  { %3479 = vmatprep.subr.bf16.mxu1 %v2254_v40 }
 0x6fc   :  { %3480 = vmatpush3.bf16.msra.mxu1 %v2246_v47 }
 0x6fd   :  { %3481 = vmatprep.subr.bf16.mxu1 %v2255_v30 }
 0x700   :  { %3482 = vmatpush3.bf16.msra.mxu1 %v2247_v43 }
 0x705   :  { %v3756_v10 = vpop.f32.mrb[124].mxu1 }
 0x706   :  { %v2227_v20 = vpop.f32.mrb[125].mxu1 }
 0x707   :  { %v3757_v38 = vpop.f32.mrb[126].mxu1 }
 0x708   :  { %v2257_v41 = vpack.c.bf16 %v3757_v38, %v3756_v10  ;;  %v2230_v44 = vpop.f32.mrb[127].mxu1 }
 0x709   :  { %v2256_v48 = vpack.c.bf16 %v2230_v44, %v2227_v20 }
 0x70b   :  { %3483 = vmatprep.subr.bf16.mxu1 %v2256_v48 }
 0x70c   :  { %3484 = vmatpush3.bf16.msra.mxu1 %v2248_v54 }
 0x70d   :  { %3485 = vmatprep.subr.bf16.mxu1 %v2257_v41 }
 0x710   :  { %3486 = vmatpush3.bf16.msra.mxu1 %v2249_v52 }
 0x713   :  { %2491 = vmatmul.mubr.bf16.vlgmr.msra.gmra.mrb[128].mxu1 %v4373_v12 }
 0x714   :  { %2498 = vmatprep.mubr.bf16.mxu1 %v4375_v14  ;;  %v4538_v14 = vld [vmem:[%s4623_s3 + $0x3] ss:$0 sm:$0xff] }
 0x71b   :  { %2499 = vmatmul.mubr.bf16.gmra.mrb[132].mxu1 %v4379_v15 }
 0x71c   :  { %2506 = vmatprep.mubr.bf16.mxu1 %v4381_v16 }
 0x723   :  { %2507 = vmatmul.mubr.bf16.gmra.mrb[136].mxu1 %v4385_v21 }
 0x724   :  { %2514 = vmatprep.mubr.bf16.mxu1 %v4387_v23 }
 0x72b   :  { %2515 = vmatmul.mubr.bf16.gmra.mrb[140].mxu1 %v4391_v45 }
 0x72c   :  { %2522 = vmatprep.mubr.bf16.mxu1 %v4393_v46 }
 0x733   :  { %2523 = vmatmul.mubr.bf16.gmra.mrb[144].mxu1 %v4397_v49  ;;  %v4544_v49 = vld [vmem:[%s4624_s4] sm:$0xff] }
 0x734   :  { %2530 = vmatprep.mubr.bf16.mxu1 %v4399_v56  ;;  %v3053_v56 = vcombine.high %v4544_v49, %v4544_v49 }
 0x736   :  { %2739 = vmatprep.mubr.bf16.mxu0 %v3053_v56 }
 0x73b   :  { %2531 = vmatmul.mubr.bf16.gmra.mrb[148].mxu1 %v4403_v59 }
 0x73c   :  { %2538 = vmatprep.mubr.bf16.mxu1 %v4405_v22 }
 0x743   :  { %2539 = vmatmul.mubr.bf16.gmra.mrb[152].mxu1 %v4409_v58 }
 0x744   :  { %2546 = vmatprep.mubr.bf16.mxu1 %v4411_v60 }
 0x74b   :  { %2547 = vmatmul.mubr.bf16.gmra.mrb[156].mxu1 %v4415_v62 }
 0x74c   :  { %2554 = vmatprep.mubr.bf16.mxu1 %v4417_v0 }
 0x753   :  { %2555 = vmatmul.mubr.bf16.gmra.mrb[160].mxu1 %v4421_v57 }
 0x754   :  { %2562 = vmatprep.mubr.bf16.mxu1 %v4423_v11 }
 0x75b   :  { %2563 = vmatmul.mubr.bf16.gmra.mrb[164].mxu1 %v4427_v50 }
 0x75c   :  { %2570 = vmatprep.mubr.bf16.mxu1 %v4429_v17 }
 0x763   :  { %2571 = vmatmul.mubr.bf16.gmra.mrb[168].mxu1 %v4433_v18 }
 0x764   :  { %2578 = vmatprep.mubr.bf16.mxu1 %v4435_v19 }
 0x76b   :  { %2579 = vmatmul.mubr.bf16.gmra.mrb[172].mxu1 %v4439_v26 }
 0x76c   :  { %2586 = vmatprep.mubr.bf16.mxu1 %v4441_v24 }
 0x773   :  { %2587 = vmatmul.mubr.bf16.gmra.mrb[176].mxu1 %v4445_v28 }
 0x774   :  { %2594 = vmatprep.mubr.bf16.mxu1 %v4447_v29 }
 0x77b   :  { %2595 = vmatmul.mubr.bf16.gmra.mrb[180].mxu1 %v4451_v32 }
 0x77c   :  { %2602 = vmatprep.mubr.bf16.mxu1 %v4453_v33 }
 0x783   :  { %2603 = vmatmul.mubr.bf16.gmra.mrb[184].mxu1 %v4457_v34 }
 0x784   :  { %2610 = vmatprep.mubr.bf16.mxu1 %v4459_v35 }
 0x78b   :  { %2611 = vmatmul.mubr.bf16.gmra.mrb[188].mxu1 %v4463_v36 }
 0x7e6   :  { %v3487_v12 = vpop.f32.mrb[128].mxu1 }
 0x7e7   :  { %v3488_v15 = vpop.f32.mrb[129].mxu1 }
 0x7e8   :  { %v3489_v16 = vadd.f32 %v3488_v15, %v3487_v12  ;;  %v3490_v21 = vpop.f32.mrb[130].mxu1 }
 0x7e9   :  { %v3491_v23 = vpop.f32.mrb[131].mxu1 }
 0x7ea   :  { %v2493_v45 = vadd.f32 %v3489_v16, %v4538_v14  ;;  %v3492_v46 = vadd.f32 %v3491_v23, %v3490_v21 }
 0x7ec   :  { %v2496_v59 = vadd.f32 %v3492_v46, %v4538_v14  ;;  %v2619_v22 = vmax.f32 %v2493_v45, 0.0 }
 0x7ee   :  { %v2620_v58 = vmax.f32 %v2496_v59, 0.0  ;;  %v3493_v60 = vpop.f32.mrb[132].mxu1 }
 0x7ef   :  { %v3494_v62 = vpop.f32.mrb[133].mxu1 }
 0x7f0   :  { %v4549_v0 = vpack.c.bf16 %v2620_v58, %v2619_v22  ;;  %v3495_v57 = vadd.f32 %v3494_v62, %v3493_v60  ;;  %v3496_v11 = vpop.f32.mrb[134].mxu1 }
 0x7f1   :  { %v3497_v50 = vpop.f32.mrb[135].mxu1 }
 0x7f2   :  { %v2501_v17 = vadd.f32 %v3495_v57, %v4538_v14  ;;  %v3498_v18 = vadd.f32 %v3497_v50, %v3496_v11 }
 0x7f4   :  { %v2504_v19 = vadd.f32 %v3498_v18, %v4538_v14  ;;  %v2621_v26 = vmax.f32 %v2501_v17, 0.0 }
 0x7f6   :  { %v2622_v24 = vmax.f32 %v2504_v19, 0.0  ;;  %v3499_v28 = vpop.f32.mrb[136].mxu1 }
 0x7f7   :  { %v3500_v29 = vpop.f32.mrb[137].mxu1 }
 0x7f8   :  { %v4553_v32 = vpack.c.bf16 %v2622_v24, %v2621_v26  ;;  %v3501_v33 = vadd.f32 %v3500_v29, %v3499_v28  ;;  %v3502_v34 = vpop.f32.mrb[138].mxu1 }
 0x7f9   :  { %v3503_v35 = vpop.f32.mrb[139].mxu1 }
 0x7fa   :  { %v2509_v36 = vadd.f32 %v3501_v33, %v4538_v14  ;;  %v3504_v31 = vadd.f32 %v3503_v35, %v3502_v34 }
 0x7fc   :  { %v2512_v39 = vadd.f32 %v3504_v31, %v4538_v14  ;;  %v2623_v43 = vmax.f32 %v2509_v36, 0.0 }
 0x7fe   :  { %v2624_v47 = vmax.f32 %v2512_v39, 0.0  ;;  %v3505_v42 = vpop.f32.mrb[140].mxu1 }
 0x7ff   :  { %v3506_v51 = vpop.f32.mrb[141].mxu1 }
 0x800   :  { %v4557_v52 = vpack.c.bf16 %v2624_v47, %v2623_v43  ;;  %v3507_v53 = vadd.f32 %v3506_v51, %v3505_v42  ;;  %v3508_v54 = vpop.f32.mrb[142].mxu1 }
 0x801   :  { %v3509_v55 = vpop.f32.mrb[143].mxu1 }
 0x802   :  { %v2517_v61 = vadd.f32 %v3507_v53, %v4538_v14  ;;  %v3510_v63 = vadd.f32 %v3509_v55, %v3508_v54 }
 0x804   :  { %v2520_v1 = vadd.f32 %v3510_v63, %v4538_v14  ;;  %v2625_v2 = vmax.f32 %v2517_v61, 0.0 }
 0x806   :  { %v2626_v3 = vmax.f32 %v2520_v1, 0.0  ;;  %v3511_v4 = vpop.f32.mrb[144].mxu1 }
 0x807   :  { %v3512_v5 = vpop.f32.mrb[145].mxu1 }
 0x808   :  { %v4561_v6 = vpack.c.bf16 %v2626_v3, %v2625_v2  ;;  %v3513_v7 = vadd.f32 %v3512_v5, %v3511_v4  ;;  %v3514_v8 = vpop.f32.mrb[146].mxu1 }
 0x809   :  { %v3515_v9 = vpop.f32.mrb[147].mxu1 }
 0x80a   :  { %v2525_v13 = vadd.f32 %v3513_v7, %v4538_v14  ;;  %v3516_v25 = vadd.f32 %v3515_v9, %v3514_v8 }
 0x80c   :  { %v2528_v27 = vadd.f32 %v3516_v25, %v4538_v14  ;;  %v2627_v30 = vmax.f32 %v2525_v13, 0.0 }
 0x80e   :  { %v2628_v37 = vmax.f32 %v2528_v27, 0.0  ;;  %v3517_v40 = vpop.f32.mrb[148].mxu1 }
 0x80f   :  { %v3518_v10 = vpop.f32.mrb[149].mxu1 }
 0x810   :  { %v4565_v20 = vpack.c.bf16 %v2628_v37, %v2627_v30  ;;  %v3519_v38 = vadd.f32 %v3518_v10, %v3517_v40  ;;  %v3520_v41 = vpop.f32.mrb[150].mxu1 }
 0x811   :  { %v3521_v44 = vpop.f32.mrb[151].mxu1 }
 0x812   :  { %v2533_v48 = vadd.f32 %v3519_v38, %v4538_v14  ;;  %v3522_v12 = vadd.f32 %v3521_v44, %v3520_v41 }
 0x814   :  { %v2536_v15 = vadd.f32 %v3522_v12, %v4538_v14  ;;  %v2629_v16 = vmax.f32 %v2533_v48, 0.0 }
 0x816   :  { %v2630_v21 = vmax.f32 %v2536_v15, 0.0  ;;  %v3523_v23 = vpop.f32.mrb[152].mxu1 }
 0x817   :  { %v3524_v45 = vpop.f32.mrb[153].mxu1 }
 0x818   :  { %v4569_v46 = vpack.c.bf16 %v2630_v21, %v2629_v16  ;;  %v3525_v56 = vadd.f32 %v3524_v45, %v3523_v23  ;;  %v3526_v59 = vpop.f32.mrb[154].mxu1 }
 0x819   :  { %v3527_v22 = vpop.f32.mrb[155].mxu1 }
 0x81a   :  { %v2541_v58 = vadd.f32 %v3525_v56, %v4538_v14  ;;  %v3528_v60 = vadd.f32 %v3527_v22, %v3526_v59 }
 0x81c   :  { %v2544_v62 = vadd.f32 %v3528_v60, %v4538_v14  ;;  %v2631_v57 = vmax.f32 %v2541_v58, 0.0 }
 0x81e   :  { %v2632_v11 = vmax.f32 %v2544_v62, 0.0  ;;  %v3529_v50 = vpop.f32.mrb[156].mxu1 }
 0x81f   :  { %v3530_v17 = vpop.f32.mrb[157].mxu1 }
 0x820   :  { %v4573_v18 = vpack.c.bf16 %v2632_v11, %v2631_v57  ;;  %v3531_v19 = vadd.f32 %v3530_v17, %v3529_v50  ;;  %v3532_v26 = vpop.f32.mrb[158].mxu1 }
 0x821   :  { %v3533_v24 = vpop.f32.mrb[159].mxu1 }
 0x822   :  { %v2549_v28 = vadd.f32 %v3531_v19, %v4538_v14  ;;  %v3534_v29 = vadd.f32 %v3533_v24, %v3532_v26 }
 0x824   :  { %v2552_v33 = vadd.f32 %v3534_v29, %v4538_v14  ;;  %v2633_v34 = vmax.f32 %v2549_v28, 0.0 }
 0x826   :  { %v2634_v35 = vmax.f32 %v2552_v33, 0.0  ;;  %v3535_v36 = vpop.f32.mrb[160].mxu1 }
 0x827   :  { %v3536_v31 = vpop.f32.mrb[161].mxu1 }
 0x828   :  { %v4577_v39 = vpack.c.bf16 %v2634_v35, %v2633_v34  ;;  %v3537_v43 = vadd.f32 %v3536_v31, %v3535_v36  ;;  %v3538_v47 = vpop.f32.mrb[162].mxu1 }
 0x829   :  { %v3539_v42 = vpop.f32.mrb[163].mxu1 }
 0x82a   :  { %v2557_v51 = vadd.f32 %v3537_v43, %v4538_v14  ;;  %v3540_v53 = vadd.f32 %v3539_v42, %v3538_v47 }
 0x82c   :  { %v2560_v54 = vadd.f32 %v3540_v53, %v4538_v14  ;;  %v2635_v55 = vmax.f32 %v2557_v51, 0.0 }
 0x82e   :  { %v2636_v61 = vmax.f32 %v2560_v54, 0.0  ;;  %v3541_v63 = vpop.f32.mrb[164].mxu1 }
 0x82f   :  { %v3542_v1 = vpop.f32.mrb[165].mxu1 }
 0x830   :  { %v3543_v2 = vadd.f32 %v3542_v1, %v3541_v63  ;;  %v3544_v3 = vpop.f32.mrb[166].mxu1  ;;  %v2659_v4 = vpack.c.bf16 %v2636_v61, %v2635_v55 }
 0x831   :  { %v3545_v5 = vpop.f32.mrb[167].mxu1 }
 0x832   :  { %v2565_v7 = vadd.f32 %v3543_v2, %v4538_v14  ;;  %v3546_v8 = vadd.f32 %v3545_v5, %v3544_v3  ;;  %3583 = vmatprep.subr.bf16.mxu0 %v2659_v4 }
 0x833   :  { %3584 = vmatpush3.bf16.msra.mxu0 %v4549_v0 }
 0x834   :  { %v2568_v9 = vadd.f32 %v3546_v8, %v4538_v14  ;;  %v2637_v13 = vmax.f32 %v2565_v7, 0.0 }
 0x836   :  { %v2638_v25 = vmax.f32 %v2568_v9, 0.0  ;;  %v3547_v27 = vpop.f32.mrb[168].mxu1 }
 0x837   :  { %v3548_v30 = vpop.f32.mrb[169].mxu1 }
 0x838   :  { %v3549_v37 = vadd.f32 %v3548_v30, %v3547_v27  ;;  %v3550_v40 = vpop.f32.mrb[170].mxu1  ;;  %v2660_v10 = vpack.c.bf16 %v2638_v25, %v2637_v13 }
 0x839   :  { %v3551_v38 = vpop.f32.mrb[171].mxu1 }
 0x83a   :  { %v2573_v41 = vadd.f32 %v3549_v37, %v4538_v14  ;;  %v3552_v44 = vadd.f32 %v3551_v38, %v3550_v40  ;;  %3585 = vmatprep.subr.bf16.mxu0 %v2660_v10 }
 0x83b   :  { %3586 = vmatpush3.bf16.msra.mxu0 %v4553_v32 }
 0x83c   :  { %v2576_v48 = vadd.f32 %v3552_v44, %v4538_v14  ;;  %v2639_v12 = vmax.f32 %v2573_v41, 0.0  ;;  %v3052_v44 = vcombine.low %v4544_v49, %v4544_v49  ;;  %v3932_v49 = vld [vmem:[#allocation9 + $0x28] sm:$0xff]  }
 0x83e   :  { %v2640_v0 = vmax.f32 %v2576_v48, 0.0  ;;  %v3553_v15 = vpop.f32.mrb[172].mxu1  ;;  %v3927_v48 = vld [vmem:[#allocation9] sm:$0xff]  }
 0x83f   :  { %v3554_v16 = vpop.f32.mrb[173].mxu1 }
 0x840   :  { %v3555_v21 = vadd.f32 %v3554_v16, %v3553_v15  ;;  %v3556_v23 = vpop.f32.mrb[174].mxu1  ;;  %v2661_v45 = vpack.c.bf16 %v2640_v0, %v2639_v12  ;;  %v4061_v12 = vmov 0.0   ;;  %v3928_v0 = vld [vmem:[#allocation9 + $0x8] sm:$0xff]   ;;  %v3931_v15 = vld [vmem:[#allocation9 + $0x20] sm:$0xff]   ;;  %v3934_v16 = vld [vmem:[#allocation9 + $0x38] sm:$0xff]  }
 0x841   :  { %v3557_v56 = vpop.f32.mrb[175].mxu1 }
 0x842   :  { %v2581_v59 = vadd.f32 %v3555_v21, %v4538_v14  ;;  %v3558_v22 = vadd.f32 %v3557_v56, %v3556_v23  ;;  %3587 = vmatprep.subr.bf16.mxu0 %v2661_v45 }
 0x843   :  { %3588 = vmatpush3.bf16.msra.mxu0 %v4557_v52 }
 0x844   :  { %v2584_v58 = vadd.f32 %v3558_v22, %v4538_v14  ;;  %v2641_v60 = vmax.f32 %v2581_v59, 0.0 }
 0x846   :  { %v2642_v32 = vmax.f32 %v2584_v58, 0.0  ;;  %v3559_v62 = vpop.f32.mrb[176].mxu1  ;;  %v3054_v58 = vld [vmem:[%s4626_s6] ss:$0 sm:$0xff] }
 0x847   :  { %v3560_v57 = vpop.f32.mrb[177].mxu1 }
 0x848   :  { %v3561_v11 = vadd.f32 %v3560_v57, %v3559_v62  ;;  %v3562_v50 = vpop.f32.mrb[178].mxu1  ;;  %v2662_v17 = vpack.c.bf16 %v2642_v32, %v2641_v60 }
 0x849   :  { %v3563_v19 = vpop.f32.mrb[179].mxu1 }
 0x84a   :  { %v2589_v26 = vadd.f32 %v3561_v11, %v4538_v14  ;;  %v3564_v24 = vadd.f32 %v3563_v19, %v3562_v50  ;;  %3589 = vmatprep.subr.bf16.mxu0 %v2662_v17 }
 0x84b   :  { %3590 = vmatpush3.bf16.msra.mxu0 %v4561_v6 }
 0x84c   :  { %v2592_v28 = vadd.f32 %v3564_v24, %v4538_v14  ;;  %v2643_v29 = vmax.f32 %v2589_v26, 0.0 }
 0x84e   :  { %v2644_v52 = vmax.f32 %v2592_v28, 0.0  ;;  %v3565_v33 = vpop.f32.mrb[180].mxu1 }
 0x84f   :  { %v3566_v34 = vpop.f32.mrb[181].mxu1 }
 0x850   :  { %v3567_v35 = vadd.f32 %v3566_v34, %v3565_v33  ;;  %v3568_v36 = vpop.f32.mrb[182].mxu1  ;;  %v2663_v31 = vpack.c.bf16 %v2644_v52, %v2643_v29 }
 0x851   :  { %v3569_v43 = vpop.f32.mrb[183].mxu1 }
 0x852   :  { %v2597_v47 = vadd.f32 %v3567_v35, %v4538_v14  ;;  %v3570_v42 = vadd.f32 %v3569_v43, %v3568_v36  ;;  %3591 = vmatprep.subr.bf16.mxu0 %v2663_v31 }
 0x853   :  { %3592 = vmatpush3.bf16.msra.mxu0 %v4565_v20 }
 0x854   :  { %v2600_v51 = vadd.f32 %v3570_v42, %v4538_v14  ;;  %v2645_v53 = vmax.f32 %v2597_v47, 0.0 }
 0x856   :  { %v2646_v6 = vmax.f32 %v2600_v51, 0.0  ;;  %v3571_v54 = vpop.f32.mrb[184].mxu1 }
 0x857   :  { %v3572_v55 = vpop.f32.mrb[185].mxu1 }
 0x858   :  { %v3573_v61 = vadd.f32 %v3572_v55, %v3571_v54  ;;  %v3574_v63 = vpop.f32.mrb[186].mxu1  ;;  %v2664_v1 = vpack.c.bf16 %v2646_v6, %v2645_v53 }
 0x859   :  { %v3575_v2 = vpop.f32.mrb[187].mxu1 }
 0x85a   :  { %v2605_v3 = vadd.f32 %v3573_v61, %v4538_v14  ;;  %v3576_v4 = vadd.f32 %v3575_v2, %v3574_v63  ;;  %3593 = vmatprep.subr.bf16.mxu0 %v2664_v1 }
 0x85b   :  { %3594 = vmatpush3.bf16.msra.mxu0 %v4569_v46 }
 0x85c   :  { %v2608_v5 = vadd.f32 %v3576_v4, %v4538_v14  ;;  %v2647_v7 = vmax.f32 %v2605_v3, 0.0 }
 0x85e   :  { %v2648_v20 = vmax.f32 %v2608_v5, 0.0  ;;  %v3577_v8 = vpop.f32.mrb[188].mxu1 }
 0x85f   :  { %v3578_v9 = vpop.f32.mrb[189].mxu1 }
 0x860   :  { %v3579_v13 = vadd.f32 %v3578_v9, %v3577_v8  ;;  %v3580_v25 = vpop.f32.mrb[190].mxu1  ;;  %v2665_v27 = vpack.c.bf16 %v2648_v20, %v2647_v7 }
 0x861   :  { %v3581_v30 = vpop.f32.mrb[191].mxu1 }
 0x862   :  { %v2613_v37 = vadd.f32 %v3579_v13, %v4538_v14  ;;  %v3582_v40 = vadd.f32 %v3581_v30, %v3580_v25  ;;  %3595 = vmatprep.subr.bf16.mxu0 %v2665_v27 }
 0x863   :  { %3596 = vmatpush3.bf16.msra.mxu0 %v4573_v18  ;;  %v3929_v18 = vld [vmem:[#allocation9 + $0x10] sm:$0xff]  }
 0x864   :  { %v2616_v10 = vadd.f32 %v3582_v40, %v4538_v14  ;;  %v2649_v38 = vmax.f32 %v2613_v37, 0.0  ;;  %v3930_v14 = vld [vmem:[#allocation9 + $0x18] sm:$0xff]  }
 0x866   :  { %v2650_v46 = vmax.f32 %v2616_v10, 0.0 }
 0x868   :  { %v2666_v41 = vpack.c.bf16 %v2650_v46, %v2649_v38 }
 0x86a   :  { %3597 = vmatprep.subr.bf16.mxu0 %v2666_v41 }
 0x86b   :  { %3598 = vmatpush3.bf16.msra.mxu0 %v4577_v39  ;;  %v3933_v39 = vld [vmem:[#allocation9 + $0x30] sm:$0xff]  }
 0x86c   :  { %3758 = vmatprep.subr.bf16.mxu0 %v4061_v12 }
 0x86e   :  { %2740 = vmatmul.mubr.bf16.vlgmr.msra.gmra.mrb[160].mxu0 %v3052_v44 }
 0x86f   :  { %3759 = vmatpush3.bf16.msra.mxu0 %v3927_v48  ;;  %3774 = vmatprep.mubr.msk.bf16.mxu0 %vm4062_vm0, %v4061_v12 }
 0x870   :  { %3760 = vmatprep.subr.bf16.mxu0 %v4061_v12 }
 0x873   :  { %3761 = vmatpush3.bf16.msra.mxu0 %v3928_v0 }
 0x874   :  { %3762 = vmatprep.subr.bf16.mxu0 %v4061_v12 }
 0x877   :  { %3763 = vmatpush3.bf16.msra.mxu0 %v3929_v18 }
 0x878   :  { %3764 = vmatprep.subr.bf16.mxu0 %v4061_v12 }
 0x87b   :  { %3765 = vmatpush3.bf16.msra.mxu0 %v3930_v14 }
 0x87c   :  { %3766 = vmatprep.subr.bf16.mxu0 %v4061_v12 }
 0x87f   :  { %3767 = vmatpush3.bf16.msra.mxu0 %v3931_v15 }
 0x880   :  { %3768 = vmatprep.subr.bf16.mxu0 %v4061_v12 }
 0x883   :  { %3769 = vmatpush3.bf16.msra.mxu0 %v3932_v49 }
 0x884   :  { %3770 = vmatprep.subr.bf16.mxu0 %v4061_v12 }
 0x887   :  { %3771 = vmatpush3.bf16.msra.mxu0 %v3933_v39 }
 0x888   :  { %3772 = vmatprep.subr.bf16.mxu0 %v4061_v12 }
 0x88b   :  { %3773 = vmatpush3.bf16.msra.mxu0 %v3934_v16 }
 0x941   :  { %v3599_v21 = vpop.f32.mrb[160].mxu0 }
 0x942   :  { %v3600_v23 = vpop.f32.mrb[161].mxu0 }
 0x943   :  { %v3601_v45 = vadd.f32 %v3600_v23, %v3599_v21  ;;  %v3602_v56 = vpop.f32.mrb[162].mxu0 }
 0x944   :  { %v3603_v59 = vpop.f32.mrb[163].mxu0 }
 0x945   :  { %v2747_v22 = vpack.c.bf16 %v3601_v45, %v3601_v45 }
 0x947   :  { %3775 = vmatmul.mubr.bf16.vlgmr.msra.gmra.mrb[164].mxu0 %v2747_v22 }
 0xa1a   :  { %v2853_v60 = vpop.f32.mrb[164].mxu0 }
 0xa1b   :  { %v2854_v32 = vadd.f32 %v3054_v58, %v2853_v60  ;;  %v3776_v62 = vpop.f32.mrb[165].mxu0 }
 0xa1c   :  { %v2856_v57 = vpop.f32.mrb[166].mxu0 }
 0xa1d   :  { %2859 = vst [vmem:[#allocation11] sm:$0xff] %v2854_v32  ;;  %v3777_v11 = vpop.f32.mrb[167].mxu0 }
 0xa1e   :  { %4034 = shalt.err (!%p4031_p8)
}
 0xa1f   :  { %s4035_s6 = scalar_lea.hbm %s4627_s7, 128 }
 0xa20   :  { %p4036_p9 = scmp.ne.s32.totalorder %s4627_s7, %s4035_s6  ;;  %p4039_p10 = scmp.lt.u32.totalorder %s4035_s6, %s4627_s7 }
 0xa22   :  { %p4041_p11 = pnand %p4039_p10, %p4036_p9 }
 0xa24   :  { %4044 = shalt.err (!%p4041_p11)
}
 0xa25   :  { %2869 = dma.vmem_to_hbm [thread:$0]  %s2867_s15, 128, %s4627_s7, [#allocation5]  }
 0xa26   :  { %4051 = dma.done.wait [#allocation5], 128  }
 0xa27   :  { %4052 = vsyncadd [#allocation5], 4294967168 }
 0xa28   :  { %2873 = vsyncpa [#allocation4], 1 }
 0xa29   :  { %2874 = vsyncpa [#allocation7], 1 }
 0xa2a   :  { %2875 = vsyncpa [#allocation10], 1 }
 0xa2b   :  { %2876 = vsyncpa [#allocation5], 1 }

</bundles_post_ra>
